<compile_context>
chip_gen: v7x
topology: tpu7x:2x2x1
jax: 0.10.0
libtpu: 0.0.40
codegen_flags: <defaults>
</compile_context>

<pallas_src>
import functools

import numpy as np
import jax
import jax.numpy as jnp
from jax.experimental import pallas as pl
from jax.experimental.pallas import tpu as pltpu


# --------------------------------------- kernel ---------------------------------------

def _make_kernel(BB, NF, W, STEP, NBP, TH):
    def kernel(audio_ref, dcs_ref, proj_ref, out_ref, frames_ref, mag_ref):
        # The magnitude spectrogram of this batch block is hdim-independent: compute it
        # only on the first hdim step and keep it in VMEM scratch for the remaining ones.
        @pl.when(pl.program_id(1) == 0)
        def _():
            # Gather overlapping frames as (NF, BB, W): each store is a sublane-dense
            # (BB, W) slab (BB chosen as a multiple of 8 when the batch allows it), and
            # STEP is a multiple of 128 so every slice is lane-aligned.
            for f in range(NF):                                   # NF is small & static
                frames_ref[f] = audio_ref[:, f * STEP: f * STEP + W].astype(jnp.bfloat16)
            frames = frames_ref[...].reshape(NF * BB, W)

            # Fused real-DFT for every frame of the batch block: one bf16 MXU matmul
            # against the lane-padded [hann*cos | -hann*sin] matrix, f32 accumulation.
            spec = jnp.dot(frames, dcs_ref[...], preferred_element_type=jnp.float32)
            re = spec[:, :NBP]                                    # 128-lane aligned slices
            im = spec[:, NBP:]
            # forward-only; padded bins are exactly 0 (add an eps/mask if a backward pass
            # through sqrt(0) is ever needed).
            mag_ref[...] = jnp.sqrt(re * re + im * im).astype(jnp.bfloat16)

        # Per-hdim-tile hyperdimensional projection (bf16 MXU, f32 acc), EUP tanh, then a
        # leading-axis frame reduction (plain VPU adds across vregs).
        z = jnp.tanh(jnp.dot(mag_ref[...], proj_ref[...],
                             preferred_element_type=jnp.float32))
        out_ref[...] = jnp.sum(z.reshape(NF, BB, TH), axis=0)
    return kernel


# ------------------------------------ host helpers ------------------------------------

def _pick_block_batch(B, NF, target_m=512):
    """Largest batch block with BB*NF <= target_m, preferring BB a multiple of 8
    (sublane-dense layouts) and >= 2 grid steps (both v7x TensorCores get work)."""
    divs = [d for d in range(1, B + 1) if B % d == 0]
    preds = (lambda d: d % 8 == 0 and B // d >= 2,
             lambda d: d % 8 == 0,
             lambda d: B // d >= 2,
             lambda d: True)
    for pred in preds:
        fits = [d for d in divs if pred(d) and d * NF <= target_m]
        if fits:
            return max(fits)
    return min(divs)


def _pick_tile_h(H):
    """hdim tile: big enough to amortize the proj stream, small enough for VMEM."""
    for th in (2048, 1024, 512, 256, 128):
        if H % th == 0:
            return th
    return H


@functools.lru_cache(maxsize=None)
def _dft_matrix(window_size, n_bins, n_bins_padded):
    """Real-DFT matrix matching torch.fft.rfft(norm='ortho') with the periodic hann
    window folded in, lane-padded and stored in bf16.  Cached per configuration."""
    n = np.arange(window_size, dtype=np.float64)
    k = np.arange(n_bins, dtype=np.float64)
    ang = 2.0 * np.pi * np.outer(n, k) / window_size
    hann = 0.5 - 0.5 * np.cos(2.0 * np.pi * n / window_size)     # torch.hann_window
    scale = 1.0 / np.sqrt(window_size)                           # rfft norm='ortho'
    dcs = np.zeros((window_size, 2 * n_bins_padded), np.float32)
    dcs[:, :n_bins] = hann[:, None] * np.cos(ang) * scale
    dcs[:, n_bins_padded:n_bins_padded + n_bins] = hann[:, None] * (-np.sin(ang)) * scale
    return jnp.asarray(dcs, dtype=jnp.bfloat16)


def prepare_hyperdim_constants(proj, window_size):
    """Build (once) the bf16 kernel constants: folded DFT matrix and lane-padded proj."""
    NB = window_size // 2 + 1
    NBP = ((NB + 127) // 128) * 128
    assert proj.shape[0] == NB, (proj.shape, NB)
    H = proj.shape[1]
    dcs = _dft_matrix(window_size, NB, NBP)
    projP = jnp.zeros((NBP, H), jnp.bfloat16).at[:NB, :].set(proj.astype(jnp.bfloat16))
    return dcs, projP


# --------------------------------------- wrapper ---------------------------------------

def hyperdim_features(audio, proj, window_size, step_size, *,
                      block_batch=None, tile_h=None, constants=None):
    """Pre-sign accumulation x = sum_frames tanh(proj.T @ |stft(audio)|), shape (B, hdim)."""
    B = audio.shape[0]
    x = audio.reshape(B, -1).astype(jnp.float32)                 # single-channel audio
    N = x.shape[-1]
    W, STEP = window_size, step_size
    NB = W // 2 + 1
    NBP = ((NB + 127) // 128) * 128                              # lane-pad the bin axis
    NF = (N + STEP - W) // STEP + 1                              # frames after pad=True
    H = proj.shape[1]
    assert proj.shape[0] == NB, (proj.shape, NB)
    assert H % 128 == 0, "hdim must be a multiple of 128 for lane-dense output stores"

    if constants is None:
        constants = prepare_hyperdim_constants(proj, W)
    dcs, projP = constants

    TH = tile_h if tile_h is not None else _pick_tile_h(H)
    assert H % TH == 0 and TH % 128 == 0, (H, TH)
    BB = block_batch if block_batch is not None else _pick_block_batch(B, NF)
    assert B % BB == 0, (B, BB)

    # pad=True: right-pad audio by step_size. Kept 2-D so batch rows are sublane-dense.
    Npad = N + STEP
    x_pad = jnp.pad(x, ((0, 0), (0, STEP)))                      # (B, Npad)

    # Per-step VMEM estimate (double-buffered streamed operands + persistent scratch).
    vmem_est = (2 * BB * Npad * 4 + 2 * W * 2 * NBP * 2 + 2 * NBP * TH * 2
                + 2 * BB * TH * 4 + NF * BB * W * 2 + NF * BB * NBP * 2)
    vmem_limit = int(min(max(2 * vmem_est, 32 << 20), 96 << 20))

    kernel = _make_kernel(BB, NF, W, STEP, NBP, TH)
    out = pl.pallas_call(
        kernel,
        out_shape=jax.ShapeDtypeStruct((B, H), jnp.float32),
        grid_spec=pltpu.PrefetchScalarGridSpec(
            num_scalar_prefetch=0,
            grid=(B // BB, H // TH),
            in_specs=[
                # audio block is constant across the hdim axis -> fetched once per batch block
                pl.BlockSpec((BB, Npad), lambda b, h: (b, 0)),
                # folded DFT constant (grid-invariant, VMEM-resident)
                pl.BlockSpec((W, 2 * NBP), lambda b, h: (0, 0)),
                # projection streamed per hdim tile (double-buffered by the pipeline)
                pl.BlockSpec((NBP, TH), lambda b, h: (0, h)),
            ],
            out_specs=pl.BlockSpec((BB, TH), lambda b, h: (b, h)),
            scratch_shapes=[
                pltpu.VMEM((NF, BB, W), jnp.bfloat16),            # gathered frames
                pltpu.VMEM((NF * BB, NBP), jnp.bfloat16),         # persistent |STFT|
            ],
        ),
        compiler_params=pltpu.CompilerParams(
            dimension_semantics=("parallel", "arbitrary"),
            vmem_limit_bytes=vmem_limit),
    )(x_pad, dcs, projP)
    return out


def hyperdim_forward(audio, proj, window_size, step_size, **kw):
    """Full module forward: straight-through sign of the accumulated projection."""
    back = hyperdim_features(audio, proj, window_size, step_size, **kw)
    fwd = jnp.sign(back)
    return back + jax.lax.stop_gradient(fwd - back)              # forward value == sign(back)


# ------------------------ pure-JAX reference (fft-based, like torch) ------------------------

def _reference(audio, proj, window_size, step_size):
    B = audio.shape[0]
    x = audio.reshape(B, -1).astype(jnp.float32)
    N = x.shape[-1]
    x = jnp.pad(x, ((0, 0), (0, step_size)))
    NF = (N + step_size - window_size) // step_size + 1
    idx = jnp.arange(NF)[:, None] * step_size + jnp.arange(window_size)[None, :]
    frames = x[:, idx]                                           # unfold -> (B, NF, W)
    n = jnp.arange(window_size)
    hann = 0.5 - 0.5 * jnp.cos(2.0 * jnp.pi * n / window_size)
    spec = jnp.abs(jnp.fft.rfft(frames * hann, axis=-1, norm='ortho'))   # (B, NF, NB)
    y = jnp.einsum('ch,bfc->bhf', proj.astype(jnp.float32), spec,
                   precision=jax.lax.Precision.HIGHEST)
    back = jnp.sum(jnp.tanh(y), axis=-1)                         # (B, hdim)
    fwd = jnp.sign(back)
    return back, back + jax.lax.stop_gradient(fwd - back)


if __name__ == "__main__":
    key = jax.random.PRNGKey(0)
    k_proj, k_audio = jax.random.split(key)

    # Small stand-ins for the module defaults (window=2048, step=256, hdim=16384) that
    # still exercise the batch and hdim grid axes and the sublane/lane-aligned layouts.
    B = 16
    n_samples = 1024
    window_size, step_size = 256, 128                            # step multiple of 128
    hdim = 1024
    n_coeffs = window_size // 2 + 1

    # buffer 'proj' ~ torch.zeros(n_coeffs, hdim).uniform_(-3, 3)
    proj = jax.random.uniform(k_proj, (n_coeffs, hdim), minval=-3.0, maxval=3.0,
                              dtype=jnp.float32)
    audio = jax.random.normal(k_audio, (B, 1, n_samples), dtype=jnp.float32)

    # Constants are prepared once (hoisted out of the per-call path).
    consts = prepare_hyperdim_constants(proj, window_size)

    back = hyperdim_features(audio, proj, window_size, step_size,
                             tile_h=256, constants=consts)       # grid = (2, 4)
    out = back + jax.lax.stop_gradient(jnp.sign(back) - back)
    back, out = jax.block_until_ready((back, out))

    ref_back, ref_out = jax.block_until_ready(_reference(audio, proj, window_size, step_size))

    back_np, out_np = np.asarray(back), np.asarray(out)
    ref_back_np, ref_out_np = np.asarray(ref_back), np.asarray(ref_out)

    assert out.shape == (B, hdim), out.shape
    # bf16 MXU operands (f32 accumulation): tolerances reflect bf16 rounding; the module's
    # forward value is sign(back), so sign agreement away from zero is the real contract.
    mean_err = np.abs(back_np - ref_back_np).mean()
    assert mean_err < 5e-2, mean_err
    np.testing.assert_allclose(back_np, ref_back_np, rtol=5e-2, atol=4e-1)
    stable = np.abs(ref_back_np) > 0.5
    np.testing.assert_array_equal(out_np[stable], ref_out_np[stable])

    print("KERNEL_OK")
</pallas_src>

<mosaic_0001>
module attributes {stable_mosaic.version = 11 : i64} {
  func.func @kernel(%arg0: i32, %arg1: i32, %arg2: memref<8x1152xf32, #tpu.memory_space<vmem>>, %arg3: memref<256x512xbf16, #tpu.memory_space<vmem>>, %arg4: memref<256x256xbf16, #tpu.memory_space<vmem>>, %arg5: memref<8x256xf32, #tpu.memory_space<vmem>>, %arg6: memref<8x8x256xbf16, #tpu.memory_space<vmem>>, %arg7: memref<64x256xbf16, #tpu.memory_space<vmem>>) attributes {dimension_semantics = [#tpu.dimension_semantics<parallel>, #tpu.dimension_semantics<arbitrary>], iteration_bounds = array<i64: 2, 4>, scalar_prefetch = 0 : i64, scratch_operands = 2 : i64, tpu.core_type = #tpu.core_type<tc>, window_params = [{transform_indices = @transform_0, window_bounds = array<i64: 8, 1152>}, {pipeline_mode = #tpu.pipeline_mode<synchronous>, transform_indices = @transform_1, window_bounds = array<i64: 256, 512>}, {transform_indices = @transform_2, window_bounds = array<i64: 256, 256>}, {transform_indices = @transform_3, window_bounds = array<i64: 8, 256>}]} {
    %c0_i32 = arith.constant 0 : i32
    %0 = arith.cmpi eq, %arg1, %c0_i32 : i32
    %1 = arith.extui %0 : i1 to i32
    %c0_i32_0 = arith.constant 0 : i32
    %2 = arith.cmpi ne, %1, %c0_i32_0 : i32
    scf.if %2 {
      %c0_7 = arith.constant 0 : index
      %c0_8 = arith.constant 0 : index
      %10 = vector.load %arg2[%c0_7, %c0_8] : memref<8x1152xf32, #tpu.memory_space<vmem>>, vector<8x256xf32>
      %11 = arith.truncf %10 : vector<8x256xf32> to vector<8x256xbf16>
      %c0_9 = arith.constant 0 : index
      %c0_10 = arith.constant 0 : index
      %c0_11 = arith.constant 0 : index
      %12 = vector.load %arg6[%c0_9, %c0_10, %c0_11] : memref<8x8x256xbf16, #tpu.memory_space<vmem>>, vector<1x8x256xbf16>
      %13 = vector.shape_cast %12 : vector<1x8x256xbf16> to vector<8x256xbf16>
      %14 = vector.shape_cast %11 : vector<8x256xbf16> to vector<1x8x256xbf16>
      tpu.vector_store %arg6[%c0_9, %c0_10, %c0_11], %14 {strides = array<i32>} : memref<8x8x256xbf16, #tpu.memory_space<vmem>>, vector<1x8x256xbf16>,
      %c0_12 = arith.constant 0 : index
      %c128 = arith.constant 128 : index
      %15 = vector.load %arg2[%c0_12, %c128] : memref<8x1152xf32, #tpu.memory_space<vmem>>, vector<8x256xf32>
      %16 = arith.truncf %15 : vector<8x256xf32> to vector<8x256xbf16>
      %c1 = arith.constant 1 : index
      %c0_13 = arith.constant 0 : index
      %c0_14 = arith.constant 0 : index
      %17 = vector.load %arg6[%c1, %c0_13, %c0_14] : memref<8x8x256xbf16, #tpu.memory_space<vmem>>, vector<1x8x256xbf16>
      %18 = vector.shape_cast %17 : vector<1x8x256xbf16> to vector<8x256xbf16>
      %19 = vector.shape_cast %16 : vector<8x256xbf16> to vector<1x8x256xbf16>
      tpu.vector_store %arg6[%c1, %c0_13, %c0_14], %19 {strides = array<i32>} : memref<8x8x256xbf16, #tpu.memory_space<vmem>>, vector<1x8x256xbf16>,
      %c0_15 = arith.constant 0 : index
      %c256 = arith.constant 256 : index
      %20 = vector.load %arg2[%c0_15, %c256] : memref<8x1152xf32, #tpu.memory_space<vmem>>, vector<8x256xf32>
      %21 = arith.truncf %20 : vector<8x256xf32> to vector<8x256xbf16>
      %c2 = arith.constant 2 : index
      %c0_16 = arith.constant 0 : index
      %c0_17 = arith.constant 0 : index
      %22 = vector.load %arg6[%c2, %c0_16, %c0_17] : memref<8x8x256xbf16, #tpu.memory_space<vmem>>, vector<1x8x256xbf16>
      %23 = vector.shape_cast %22 : vector<1x8x256xbf16> to vector<8x256xbf16>
      %24 = vector.shape_cast %21 : vector<8x256xbf16> to vector<1x8x256xbf16>
      tpu.vector_store %arg6[%c2, %c0_16, %c0_17], %24 {strides = array<i32>} : memref<8x8x256xbf16, #tpu.memory_space<vmem>>, vector<1x8x256xbf16>,
      %c0_18 = arith.constant 0 : index
      %c384 = arith.constant 384 : index
      %25 = vector.load %arg2[%c0_18, %c384] : memref<8x1152xf32, #tpu.memory_space<vmem>>, vector<8x256xf32>
      %26 = arith.truncf %25 : vector<8x256xf32> to vector<8x256xbf16>
      %c3 = arith.constant 3 : index
      %c0_19 = arith.constant 0 : index
      %c0_20 = arith.constant 0 : index
      %27 = vector.load %arg6[%c3, %c0_19, %c0_20] : memref<8x8x256xbf16, #tpu.memory_space<vmem>>, vector<1x8x256xbf16>
      %28 = vector.shape_cast %27 : vector<1x8x256xbf16> to vector<8x256xbf16>
      %29 = vector.shape_cast %26 : vector<8x256xbf16> to vector<1x8x256xbf16>
      tpu.vector_store %arg6[%c3, %c0_19, %c0_20], %29 {strides = array<i32>} : memref<8x8x256xbf16, #tpu.memory_space<vmem>>, vector<1x8x256xbf16>,
      %c0_21 = arith.constant 0 : index
      %c512 = arith.constant 512 : index
      %30 = vector.load %arg2[%c0_21, %c512] : memref<8x1152xf32, #tpu.memory_space<vmem>>, vector<8x256xf32>
      %31 = arith.truncf %30 : vector<8x256xf32> to vector<8x256xbf16>
      %c4 = arith.constant 4 : index
      %c0_22 = arith.constant 0 : index
      %c0_23 = arith.constant 0 : index
      %32 = vector.load %arg6[%c4, %c0_22, %c0_23] : memref<8x8x256xbf16, #tpu.memory_space<vmem>>, vector<1x8x256xbf16>
      %33 = vector.shape_cast %32 : vector<1x8x256xbf16> to vector<8x256xbf16>
      %34 = vector.shape_cast %31 : vector<8x256xbf16> to vector<1x8x256xbf16>
      tpu.vector_store %arg6[%c4, %c0_22, %c0_23], %34 {strides = array<i32>} : memref<8x8x256xbf16, #tpu.memory_space<vmem>>, vector<1x8x256xbf16>,
      %c0_24 = arith.constant 0 : index
      %c640 = arith.constant 640 : index
      %35 = vector.load %arg2[%c0_24, %c640] : memref<8x1152xf32, #tpu.memory_space<vmem>>, vector<8x256xf32>
      %36 = arith.truncf %35 : vector<8x256xf32> to vector<8x256xbf16>
      %c5 = arith.constant 5 : index
      %c0_25 = arith.constant 0 : index
      %c0_26 = arith.constant 0 : index
      %37 = vector.load %arg6[%c5, %c0_25, %c0_26] : memref<8x8x256xbf16, #tpu.memory_space<vmem>>, vector<1x8x256xbf16>
      %38 = vector.shape_cast %37 : vector<1x8x256xbf16> to vector<8x256xbf16>
      %39 = vector.shape_cast %36 : vector<8x256xbf16> to vector<1x8x256xbf16>
      tpu.vector_store %arg6[%c5, %c0_25, %c0_26], %39 {strides = array<i32>} : memref<8x8x256xbf16, #tpu.memory_space<vmem>>, vector<1x8x256xbf16>,
      %c0_27 = arith.constant 0 : index
      %c768 = arith.constant 768 : index
      %40 = vector.load %arg2[%c0_27, %c768] : memref<8x1152xf32, #tpu.memory_space<vmem>>, vector<8x256xf32>
      %41 = arith.truncf %40 : vector<8x256xf32> to vector<8x256xbf16>
      %c6 = arith.constant 6 : index
      %c0_28 = arith.constant 0 : index
      %c0_29 = arith.constant 0 : index
      %42 = vector.load %arg6[%c6, %c0_28, %c0_29] : memref<8x8x256xbf16, #tpu.memory_space<vmem>>, vector<1x8x256xbf16>
      %43 = vector.shape_cast %42 : vector<1x8x256xbf16> to vector<8x256xbf16>
      %44 = vector.shape_cast %41 : vector<8x256xbf16> to vector<1x8x256xbf16>
      tpu.vector_store %arg6[%c6, %c0_28, %c0_29], %44 {strides = array<i32>} : memref<8x8x256xbf16, #tpu.memory_space<vmem>>, vector<1x8x256xbf16>,
      %c0_30 = arith.constant 0 : index
      %c896 = arith.constant 896 : index
      %45 = vector.load %arg2[%c0_30, %c896] : memref<8x1152xf32, #tpu.memory_space<vmem>>, vector<8x256xf32>
      %46 = arith.truncf %45 : vector<8x256xf32> to vector<8x256xbf16>
      %c7 = arith.constant 7 : index
      %c0_31 = arith.constant 0 : index
      %c0_32 = arith.constant 0 : index
      %47 = vector.load %arg6[%c7, %c0_31, %c0_32] : memref<8x8x256xbf16, #tpu.memory_space<vmem>>, vector<1x8x256xbf16>
      %48 = vector.shape_cast %47 : vector<1x8x256xbf16> to vector<8x256xbf16>
      %49 = vector.shape_cast %46 : vector<8x256xbf16> to vector<1x8x256xbf16>
      tpu.vector_store %arg6[%c7, %c0_31, %c0_32], %49 {strides = array<i32>} : memref<8x8x256xbf16, #tpu.memory_space<vmem>>, vector<1x8x256xbf16>,
      %c0_33 = arith.constant 0 : index
      %c0_34 = arith.constant 0 : index
      %c0_35 = arith.constant 0 : index
      %50 = vector.load %arg6[%c0_33, %c0_34, %c0_35] : memref<8x8x256xbf16, #tpu.memory_space<vmem>>, vector<8x8x256xbf16>
      %51 = vector.shape_cast %50 : vector<8x8x256xbf16> to vector<64x256xbf16>
      %c0_36 = arith.constant 0 : index
      %c0_37 = arith.constant 0 : index
      %52 = vector.load %arg3[%c0_36, %c0_37] : memref<256x512xbf16, #tpu.memory_space<vmem>>, vector<256x512xbf16>
      %cst_38 = arith.constant dense<0.000000e+00> : vector<64x512xf32>
      %53 = tpu.matmul %51, %52, %cst_38 {dimension_numbers = #tpu.dot_dimension_numbers<[1], [0], [0], [1], [0, 0, 1, 1], [], []>} : vector<64x256xbf16>, vector<256x512xbf16>, vector<64x512xf32> -> vector<64x512xf32>
      %54 = vector.extract_strided_slice %53 {offsets = [0, 0], sizes = [64, 256], strides = [1, 1]} : vector<64x512xf32> to vector<64x256xf32>
      %55 = vector.extract_strided_slice %53 {offsets = [0, 256], sizes = [64, 256], strides = [1, 1]} : vector<64x512xf32> to vector<64x256xf32>
      %56 = arith.mulf %54, %54 : vector<64x256xf32>
      %57 = arith.mulf %55, %55 : vector<64x256xf32>
      %58 = arith.addf %56, %57 : vector<64x256xf32>
      %59 = math.sqrt %58 : vector<64x256xf32>
      %60 = arith.truncf %59 : vector<64x256xf32> to vector<64x256xbf16>
      %c0_39 = arith.constant 0 : index
      %c0_40 = arith.constant 0 : index
      %61 = vector.load %arg7[%c0_39, %c0_40] : memref<64x256xbf16, #tpu.memory_space<vmem>>, vector<64x256xbf16>
      tpu.vector_store %arg7[%c0_39, %c0_40], %60 {strides = array<i32>} : memref<64x256xbf16, #tpu.memory_space<vmem>>, vector<64x256xbf16>,
    } else {
    }
    %c0 = arith.constant 0 : index
    %c0_1 = arith.constant 0 : index
    %3 = vector.load %arg7[%c0, %c0_1] : memref<64x256xbf16, #tpu.memory_space<vmem>>, vector<64x256xbf16>
    %c0_2 = arith.constant 0 : index
    %c0_3 = arith.constant 0 : index
    %4 = vector.load %arg4[%c0_2, %c0_3] : memref<256x256xbf16, #tpu.memory_space<vmem>>, vector<256x256xbf16>
    %cst = arith.constant dense<0.000000e+00> : vector<64x256xf32>
    %5 = tpu.matmul %3, %4, %cst {dimension_numbers = #tpu.dot_dimension_numbers<[1], [0], [0], [1], [0, 0, 1, 1], [], []>} : vector<64x256xbf16>, vector<256x256xbf16>, vector<64x256xf32> -> vector<64x256xf32>
    %6 = math.tanh %5 : vector<64x256xf32>
    %7 = vector.shape_cast %6 : vector<64x256xf32> to vector<8x8x256xf32>
    %cst_4 = arith.constant dense<0.000000e+00> : vector<8x256xf32>
    %8 = vector.multi_reduction <add>, %7, %cst_4 [0] : vector<8x8x256xf32> to vector<8x256xf32>
    %c0_5 = arith.constant 0 : index
    %c0_6 = arith.constant 0 : index
    %9 = vector.load %arg5[%c0_5, %c0_6] : memref<8x256xf32, #tpu.memory_space<vmem>>, vector<8x256xf32>
    tpu.vector_store %arg5[%c0_5, %c0_6], %8 {strides = array<i32>} : memref<8x256xf32, #tpu.memory_space<vmem>>, vector<8x256xf32>,
    return
  }
  func.func @transform_0(%arg0: i32, %arg1: i32) -> (i32, i32) {
    %c0_i32 = arith.constant 0 : i32
    %c0_i32_0 = arith.constant 0 : i32
    return %arg0, %c0_i32 : i32, i32
  }
  func.func @transform_1(%arg0: i32, %arg1: i32) -> (i32, i32) {
    %c0_i32 = arith.constant 0 : i32
    %c0_i32_0 = arith.constant 0 : i32
    %c0_i32_1 = arith.constant 0 : i32
    return %c0_i32, %c0_i32_0 : i32, i32
  }
  func.func @transform_2(%arg0: i32, %arg1: i32) -> (i32, i32) {
    %c0_i32 = arith.constant 0 : i32
    %c0_i32_0 = arith.constant 0 : i32
    return %c0_i32, %arg1 : i32, i32
  }
  func.func @transform_3(%arg0: i32, %arg1: i32) -> (i32, i32) {
    %c0_i32 = arith.constant 0 : i32
    return %arg0, %arg1 : i32, i32
  }
}

</mosaic_0001>

<bundles_post_ra>
// kernel: tpu_custom_call.1
= control target key start
LH: loop header
LB: loop body
LE: loop exit
PB: predicated region body
PF: predicated region fallthrough
CT: control target
= control target key end

     0   :  { %s2908_s0 = inlined_call_operand.hbm [shape: f32[16,1152], index: 0, kind: input, shape index: {}]   ;;  %s2909_s1 = inlined_call_operand.hbm [shape: bf16[256,512], index: 1, kind: input, shape index: {}]   ;;  %s2910_s2 = inlined_call_operand.hbm [shape: bf16[256,1024], index: 2, kind: input, shape index: {}]   ;;  %s2911_s3 = inlined_call_operand.hbm [shape: f32[16,1024], index: 3, kind: output, shape index: {}]  }
   0x1   :  { %2928 = sst [smem:[#allocation27_spill]] %s2908_s0 }
   0x2   :  { %2929 = sst [smem:[#allocation28_spill]] %s2911_s3 }
   0x3   :  { %8 = vsyncpa [#allocation5], 0 }
   0x4   :  { %10 = vsyncpa [#allocation5 + $0x1], 0 }
   0x5   :  { %11 = vsyncpa [#allocation8], 0 }
   0x6   :  { %12 = vsyncpa [#allocation6], 0 }
   0x7   :  { %14 = vsyncpa [#allocation6 + $0x1], 0  ;;  %s2356_s12 = smov 0   ;;  %s2358_s13 = smov 0  }
   0x8   :  { %s2360_s14 = smov 0   ;;  %s2362_s15 = smov 0  }
   0x9   :  { %s2364_s16 = smov 0   ;;  %s2366_s17 = smov 0  }
   0xa   :  { %s2368_s18 = smov 0   ;;  %s2370_s19 = smov 0  }
   0xb   :  { %s2372_s20 = smov 0   ;;  %s2374_s21 = smov 0  }
   0xc   :  { %s2376_s22 = smov 0   ;;  %s2378_s23 = smov 0  }
   0xd   :  { %s2380_s24 = smov 0   ;;  %s2382_s25 = smov 0  }
   0xe LB: > { %2930 = sst [smem:[#allocation15_spill]] %s2273_s12  ;;  %s29_s26 = sadd.s32 1, %s2317_s23  ;;  %s2325_s25 = sphi %s2382_s25, %s20_s25   ;;  %s2321_s24 = sphi %s2380_s24, %s2984_s24   ;;  %s2317_s23 = sphi %s2378_s23, %s2974_s23   ;;  %s2313_s22 = sphi %s2376_s22, %s2973_s22   ;;  %s2309_s21 = sphi %s2374_s21, %s2972_s21   ;;  %s2305_s20 = sphi %s2372_s20, %s2983_s20   ;;  %s2301_s19 = sphi %s2370_s19, %s2982_s19   ;;  %s2297_s18 = sphi %s2368_s18, %s2981_s18   ;;  %s2293_s17 = sphi %s2366_s17, %s2969_s17   ;;  %s2289_s16 = sphi %s2364_s16, %s2980_s16   ;;  %s2285_s15 = sphi %s2362_s15, %s2979_s15   ;;  %s2281_s14 = sphi %s2360_s14, %s2967_s14   ;;  %s2277_s13 = sphi %s2358_s13, %s2978_s13   ;;  %s2273_s12 = sphi %s2356_s12, %s2977_s12  }
   0xf   : > { %2931 = sst [smem:[#allocation16_spill]] %s2281_s14  ;;  %s32_s27 = sadd.s32 1, %s2321_s24 }
  0x10   : > { %2932 = sst [smem:[#allocation17_spill]] %s2293_s17  ;;  %p30_p0 = scmp.ge.s32.totalorder %s29_s26, 4 }
  0x11   : > { %2933 = sst [smem:[#allocation18_spill]] %s2305_s20  ;;  %s39_s28 = sadd.s32 1, %s2305_s20 }
  0x12   : > { %2934 = sst [smem:[#allocation19_spill]] %s2317_s23  ;;  %p46_p1 = scmp.ne.s32.totalorder %s2305_s20, %s2301_s19 }
  0x13   : > { %2935 = sst [smem:[#allocation20_spill]] %s2321_s24  ;;  %p47_p2 = scmp.eq.s32.totalorder %s2325_s25, 0 }
  0x14   : > { %s2986_s26 = smov (%p30_p0, %s29_s26), 0  ;;  %s2988_s27 = smov (!%p30_p0, %s32_s27), %s2321_s24 }
  0x15   : > { %2936 = sst [smem:[#allocation21_spill]] %s2986_s26  ;;  %p2437_p3 = por %p47_p2, %p46_p1 }
  0x16   : > { %p34_p5 = scmp.ge.s32.totalorder %s2988_s27, 2  ;;  %s83_s30 = ssub.s32 %s2317_s23, %s2986_s26 }
  0x17   : > { %p84_p6 = scmp.eq.s32.totalorder %s83_s30, 0  ;;  %s86_s4 = sadd.s32 1, %s2293_s17 }
  0x18   : > { %s2990_s27 = smov (%p34_p5, %s2988_s27), 0  ;;  %p93_p7 = scmp.ne.s32.totalorder %s2293_s17, %s2289_s16 }
  0x19   : > { %2938 = sst [smem:[#allocation22_spill]] %s2990_s27  ;;  %s36_s6 = ssub.s32 %s2321_s24, %s2990_s27 }
  0x1a   : > { %s2449_s5 = scalar_select %p84_p6, %s2293_s17, %s86_s4  }
  0x1b   : > { %p37_p8 = scmp.eq.s32.totalorder %s36_s6, 0  ;;  %p95_p10 = por %p93_p7, %p47_p2 }
  0x1c   : > { %2939 = sst [smem:[#allocation23_spill]] %s2449_s5  ;;  %s111_s7 = sor.u32 %s83_s30, %s36_s6 }
  0x1d   : > { %s2460_s8 = scalar_select %p37_p8, %s2305_s20, %s39_s28  }
  0x1e   : > { %p112_p11 = scmp.eq.s32.totalorder %s111_s7, 0  ;;  %s114_s9 = sadd.s32 1, %s2281_s14 }
  0x1f   : > { %2940 = sst [smem:[#allocation24_spill]] %s2460_s8  ;;  %p1754_p12 = scmp.lt.s32.totalorder %s2325_s25, 8 }
  0x20   : > { %s2465_s10 = scalar_select %p112_p11, %s2281_s14, %s114_s9  }
  0x21   : > { %s164_s11 = sand.u32 1, %s2325_s25   ;;  %s166_s26 = sand.u32 1, %s2305_s20  }
  0x22   : > { %2941 = sst [smem:[#allocation25_spill]] %s2465_s10  ;;  %s1725_s3 = smul.u32 72, %s166_s26 }
  0x23   : > { %s1726_s4 = smul.u32 1152, %s2321_s24  ;;  %p2472_p13 = pnand %p1754_p12, %p2437_p3 }
  0x24   : > { %p2476_p0 = pnand %p1754_p12, %p95_p10  ;;  %s2944_s0 = sld [smem:[#allocation27_spill]] }
  0x25   : > { %s168_s26 = scalar_lea.vmem [#allocation4], %s1725_s3  ;;  %s2487_s9 = scalar_lea.sflag [#allocation5], %s164_s11 }
  0x26   : > { %s2943_s30 = scalar_select %p2476_p0, 1, 0 }
  0x27   : > { %s176_s29 = sshll.u32 %s168_s26, 4  ;;  %p2085_p2 = pneg %p2472_p13  ;;  %s2485_s29 = int_to_ptr.vmem [resolvable:$true] %s176_s29 }
  0x2a   : > { %s2483_s7 = scalar_lea.hbm %s2944_s0, %s1726_s4  ;;  %s2088_s6 = scalar_lea.hbm %s2944_s0, 2304 }
  0x2b   : > { %s2083_s24 = scalar_lea.hbm %s2483_s7, 1152  ;;  %p2089_p6 = scmp.lt.u32.totalorder %s2483_s7, %s2944_s0 }
  0x2c   : > { %p2084_p1 = scmp.ne.s32.totalorder %s2483_s7, %s2083_s24  ;;  %p2090_p7 = scmp.lt.u32.totalorder %s2088_s6, %s2083_s24 }
  0x2d   : > { %p2092_p10 = scmp.lt.u32.totalorder %s2083_s24, %s2483_s7 }
  0x2e   : > { %p2086_p3 = pnand %p2085_p2, %p2084_p1  ;;  %p2091_p8 = por %p2090_p7, %p2089_p6 }
  0x30   : > { %p2087_p5 = pneg %p2086_p3  ;;  %p2093_p11 = por %p2092_p10, %p2091_p8 }
  0x32   : > { %p2094_p12 = pnand %p2093_p11, %p2087_p5 }
  0x34   : > { %2097 = shalt.err (!%p2094_p12)
}
  0x35   : > { %s2098_s3 = scalar_lea.vmem %s2485_s29, 1152  ;;  %s2327_s11 = smov [#allocation4]  }
  0x36   : > { %p2099_p1 = scmp.ne.s32.totalorder %s2485_s29, %s2098_s3  ;;  %s2103_s26 = sshll.u32 %s2327_s11, 4  ;;  %s2104_s26 = int_to_ptr.vmem [resolvable:$false] %s2103_s26 }
  0x37   : > { %s2105_s20 = scalar_lea.vmem %s2104_s26, 2304  ;;  %p2106_p4 = scmp.lt.s32.totalorder %s2485_s29, %s2104_s26 }
  0x38   : > { %p2101_p3 = pnand %p2099_p1, %p2085_p2  ;;  %p2107_p6 = scmp.lt.s32.totalorder %s2105_s20, %s2098_s3 }
  0x3a   : > { %p2102_p9 = pneg %p2101_p3  ;;  %p2108_p7 = por %p2107_p6, %p2106_p4 }
  0x3c   : > { %p2109_p8 = pnand %p2108_p7, %p2102_p9 }
  0x3e   : > { %2112 = shalt.err (!%p2109_p8)
}
  0x3f   : > { %1745 = dma.hbm_to_vmem [thread:$0]  (!%p2472_p13), %s2483_s7, 1152, %s2485_s29, %s2487_s9  }
  0x40   : > { %s2516_s24 = sadd.s32 4294967295, %s2325_s25   ;;  %s1545_s27 = sadd.s32 4294967294, %s2325_s25  }
  0x41   : > { %p2922_p4 = scmp.eq.s32.totalorder %s2516_s24, 0  ;;  %p124_p9 = scmp.ne.s32.totalorder %s2281_s14, %s2277_s13 }
  0x42   : > { %p125_p2 = scmp.eq.s32.totalorder %s2516_s24, 7  ;;  %p2945_p5 = scmp.ne.s32.totalorder %s2301_s19, %s2297_s18 }
  0x43   : > { %p2947_p13 = scmp.ne.s32.totalorder %s2289_s16, %s2285_s15  ;;  %p130_p1 = scmp.ne.s32.totalorder %s2277_s13, %s2273_s12 }
  0x44   : > { %p2528_p10 = por %p2922_p4, %p2945_p5  ;;  %p2541_p12 = por %p125_p2, %p124_p9 }
  0x45   : > { %p2537_p11 = por %p2947_p13, %p2922_p4  ;;  %p131_p3 = scmp.eq.s32.totalorder %s1545_s27, 7 }
  0x46   : > { %s2946_s8 = scalar_select %p2528_p10, 1, 0 }
  0x47   : > { %s2948_s7 = scalar_select %p2537_p11, 1, 0 }
  0x48   : > { %s2949_s29 = scalar_select %p2541_p12, 1, 0 }
  0x49   : > { %p1546_p6 = scmp.ge.s32.totalorder %s2325_s25, 1  ;;  %p138_p7 = scmp.lt.s32.totalorder %s2325_s25, 9 }
  0x4a   : > { %p2549_p8 = por %p131_p3, %p130_p1  ;;  %s2328_s15 = smov [#allocation7]  }
  0x4b   : > { %p2553_p5 = pnand %p1546_p6, %p138_p7  ;;  %s150_s28 = sshll.u32 %s2328_s15, 4  ;;  %s2557_s28 = int_to_ptr.vmem [resolvable:$true] %s150_s28 }
  0x4c   : > { %s2950_s18 = scalar_select %p2549_p8, 1, 0 }
  0x4d   : > { %s2952_s4 = scalar_select %p2553_p5, 1, 0 }
  0x4e   : > { %2951 = sst [smem:[#allocation26_spill]] %s2950_s18  ;;  %p1738_p9 = pneg %p2553_p5 }
  0x4f   : > { %s185_s6 = sand.u32 1, %s2293_s17   ;;  %s1676_s3 = sshll.u32 %s2317_s23, 7 }
  0x50   : > { %p2565_p2 = pnand %p1738_p9, %p2922_p4  ;;  %s1550_s26 = sshll.u32 %s185_s6, 8 }
  0x51   : > { %s2572_s0 = scalar_lea.hbm %s2910_s2, %s1676_s3  ;;  %s187_s5 = scalar_lea.vmem [#allocation9], %s1550_s26 }
  0x52   : > { %s194_s15 = sshll.u32 %s187_s5, 4  ;;  %s2113_s18 = scalar_lea.hbm %s2909_s1, 8192  ;;  %s2595_s15 = int_to_ptr.vmem [resolvable:$true] %s194_s15 }
  0x53   : > { %p2114_p13 = scmp.ne.s32.totalorder %s2909_s1, %s2113_s18  ;;  %p2115_p1 = pneg %p2565_p2 }
  0x54   : > { %p2120_p7 = scmp.lt.u32.totalorder %s2113_s18, %s2909_s1 }
  0x55   : > { %p2116_p3 = pnand %p2115_p1, %p2114_p13 }
  0x57   : > { %p2117_p6 = pneg %p2116_p3 }
  0x59   : > { %p2122_p9 = pnand %p2120_p7, %p2117_p6 }
  0x5b   : > { %2125 = shalt.err (!%p2122_p9)
}
  0x5c   : > { %s2126_s5 = scalar_lea.vmem %s2557_s28, 8192  ;;  %p2134_p11 = scmp.lt.s32.totalorder %s2557_s28, %s2557_s28 }
  0x5d   : > { %p2127_p4 = scmp.ne.s32.totalorder %s2557_s28, %s2126_s5  ;;  %p2135_p10 = scmp.lt.s32.totalorder %s2126_s5, %s2126_s5 }
  0x5f   : > { %p2129_p8 = pnand %p2127_p4, %p2115_p1  ;;  %p2136_p5 = por %p2135_p10, %p2134_p11 }
  0x61   : > { %p2130_p12 = pneg %p2129_p8 }
  0x63   : > { %p2137_p0 = pnand %p2136_p5, %p2130_p12 }
  0x65   : > { %2140 = shalt.err (!%p2137_p0)
}
  0x66   : > { %s2329_s14 = smov 256   ;;  %s2330_s12 = smov 16  }
  0x67   : > { %1741 = dma.hbm_to_vmem [thread:$0]  (!%p2565_p2), %s2909_s1, 8192, %s2557_s28, [#allocation8], %s2329_s14, %s2329_s14, %s2330_s12  }
  0x68   : > { %s2141_s10 = scalar_lea.hbm %s2572_s0, 4096  ;;  %p2954_p0 = scmp.ne.s32.totalorder %s2943_s30, 0 }
  0x69   : > { %p2142_p4 = scmp.ne.s32.totalorder %s2572_s0, %s2141_s10  ;;  %s2146_s26 = scalar_lea.hbm %s2910_s2, 16384 }
  0x6a   : > { %p2143_p10 = pneg %p2954_p0  ;;  %p2147_p8 = scmp.lt.u32.totalorder %s2572_s0, %s2910_s2 }
  0x6b   : > { %p2148_p5 = scmp.lt.u32.totalorder %s2146_s26, %s2141_s10  ;;  %p2150_p13 = scmp.lt.u32.totalorder %s2141_s10, %s2572_s0 }
  0x6c   : > { %p2144_p11 = pnand %p2143_p10, %p2142_p4 }
  0x6d   : > { %p2149_p2 = por %p2148_p5, %p2147_p8 }
  0x6e   : > { %p2145_p12 = pneg %p2144_p11 }
  0x6f   : > { %p2151_p1 = por %p2150_p13, %p2149_p2 }
  0x71   : > { %p2152_p3 = pnand %p2151_p1, %p2145_p12 }
  0x73   : > { %2155 = shalt.err (!%p2152_p3)
}
  0x74   : > { %s2156_s28 = scalar_lea.vmem %s2595_s15, 4096  ;;  %s2331_s27 = smov [#allocation9]  }
  0x75   : > { %p2157_p6 = scmp.ne.s32.totalorder %s2595_s15, %s2156_s28  ;;  %s2161_s6 = sshll.u32 %s2331_s27, 4  ;;  %s2162_s6 = int_to_ptr.vmem [resolvable:$false] %s2161_s6 }
  0x76   : > { %s2163_s5 = scalar_lea.vmem %s2162_s6, 8192  ;;  %p2164_p4 = scmp.lt.s32.totalorder %s2595_s15, %s2162_s6 }
  0x77   : > { %p2159_p7 = pnand %p2157_p6, %p2143_p10  ;;  %p2165_p11 = scmp.lt.s32.totalorder %s2163_s5, %s2156_s28 }
  0x79   : > { %p2160_p9 = pneg %p2159_p7  ;;  %p2166_p8 = por %p2165_p11, %p2164_p4 }
  0x7b   : > { %p2167_p5 = pnand %p2166_p8, %p2160_p9 }
  0x7d   : > { %2170 = shalt.err (!%p2167_p5)
}
  0x7e   : > { %s2332_s14 = smov 512   ;;  %s2333_s12 = smov 128  }
  0x7f   : > { %s2334_s17 = smov 8   ;;  %p2955_p10 = scmp.ne.s32.totalorder %s2952_s4, 0 }
  0x80   : > { %1748 = dma.hbm_to_vmem [thread:$0]  (!%p2954_p0), %s2572_s0, 4096, %s2595_s15, %s2487_s9, %s2332_s14, %s2333_s12, %s2334_s17  }
  0x81   : > { %206 = sbr.rel (%p2955_p10) target bundleno = 798 (0x31e), region = 32  ;;  %s208_s23 = sand.u32 (!%p2955_p10), 1, %s2516_s24  }
  0x82   : > { %s210_s10 = sand.u32 (!%p2955_p10), 1, %s2301_s19   ;;  %s209_s3 = scalar_lea.sflag (!%p2955_p10), [#allocation5], %s208_s23 }
  0x83   : > { %s1727_s18 = smul.u32 (!%p2955_p10), 72, %s210_s10  ;;  %p2956_p12 = scmp.ne.s32.totalorder (!%p2955_p10), %s2946_s8, 0 }
  0x85   : > { %s2627_s26 = scalar_lea.vmem (!%p2955_p10), [#allocation4], %s1727_s18 }
  0x88   : > { %2256 = dma.done.wait (%p2956_p12), %s209_s3, 1152  }
  0x89   : > { %2258 = vsyncadd (%p2956_p12), %s209_s3, 4294966144  ;;  %p2957_p2 = scmp.eq.s32.totalorder %s2516_s24, 0 }
  0x8b   : > { %2260 = dma.done.wait (%p2957_p2), [#allocation8], 8192   ;;  %p2958_p0 = pmov %p2957_p2 }
  0x8c   : > { %s223_s0 = sand.u32 1, %s2289_s16   ;;  %p2959_p13 = scmp.ne.s32.totalorder %s2948_s7, 0 }
  0x8d   : > { %2262 = vsyncadd (%p2958_p0), [#allocation8], 4294959104  ;;  %s1555_s30 = sshll.u32 %s223_s0, 8 }
  0x8e   : > { %s2638_s9 = scalar_lea.vmem [#allocation9], %s1555_s30 }
  0x8f   : > { %2264 = dma.done.wait (%p2959_p13), %s209_s3, 4096  }
  0x90   : > { %2266 = vsyncadd (%p2959_p13), %s209_s3, 4294963200  ;;  %s250_s8 = sand.u32 1, %s2277_s13   ;;  %p1557_p1 = scmp.ne.s32.totalorder %s2309_s21, 0 }
  0x91   : > { %s1556_s4 = sshll.u32 %s250_s8, 4  ;;  %v1875_v0 = vld [vmem:[#allocation7 + $0x4] ss:$16 sps:$4 sm:$0xff] (!%p1557_p1)   ;;  %v1877_v1 = vld [vmem:[#allocation7 + $0xc] ss:$16 sps:$4 sm:$0xff] (!%p1557_p1)  }
  0x92   : > { %s2647_s15 = scalar_lea.vmem [#allocation10], %s1556_s4  ;;  %258 = sbr.rel (%p1557_p1) target bundleno = 475 (0x1db), region = 48  ;;  %786 = vmatprep.subr.bf16.mxu0 (!%p1557_p1), %v1875_v0  ;;  %v1879_v2 = vld [vmem:[#allocation7] ss:$16 sps:$4 sm:$0xff] (!%p1557_p1)   ;;  %v1880_v3 = vld [vmem:[#allocation7 + $0x8] ss:$16 sps:$4 sm:$0xff] (!%p1557_p1)   ;;  %859 = vmatprep.subr.bf16.mxu1 (!%p1557_p1), %v1877_v1 }
  0x93   : > { %v1881_v4 = vld [vmem:[#allocation7 + $0x24] ss:$16 sps:$4 sm:$0xff] (!%p1557_p1)   ;;  %787 = vmatpush1.bf16.msra.mxu0 (!%p1557_p1), %v1879_v2  ;;  %860 = vmatpush1.bf16.msra.mxu1 (!%p1557_p1), %v1880_v3  ;;  %v1883_v5 = vld [vmem:[#allocation7 + $0x2c] ss:$16 sps:$4 sm:$0xff] (!%p1557_p1)   ;;  %v1885_v6 = vld [vmem:[#allocation7 + $0x20] ss:$16 sps:$4 sm:$0xff] (!%p1557_p1)  }
  0x94   : > { %788 = vmatprep.subr.bf16.mxu0 (!%p1557_p1), %v1881_v4  ;;  %v1886_v7 = vld [vmem:[#allocation7 + $0x28] ss:$16 sps:$4 sm:$0xff] (!%p1557_p1)   ;;  %861 = vmatprep.subr.bf16.mxu1 (!%p1557_p1), %v1883_v5  ;;  %v1887_v8 = vld [vmem:[#allocation7 + $0x44] ss:$16 sps:$4 sm:$0xff] (!%p1557_p1)   ;;  %v1889_v9 = vld [vmem:[#allocation7 + $0x4c] ss:$16 sps:$4 sm:$0xff] (!%p1557_p1)  }
  0x95   : > { %v1891_v10 = vld [vmem:[#allocation7 + $0x40] ss:$16 sps:$4 sm:$0xff] (!%p1557_p1)   ;;  %v1892_v11 = vld [vmem:[#allocation7 + $0x48] ss:$16 sps:$4 sm:$0xff] (!%p1557_p1)   ;;  %v1893_v12 = vld [vmem:[#allocation7 + $0x64] ss:$16 sps:$4 sm:$0xff] (!%p1557_p1)  }
  0x96   : > { %v1895_v13 = vld [vmem:[#allocation7 + $0x6c] ss:$16 sps:$4 sm:$0xff] (!%p1557_p1)   ;;  %v1897_v14 = vld [vmem:[#allocation7 + $0x60] ss:$16 sps:$4 sm:$0xff] (!%p1557_p1)   ;;  %v1898_v15 = vld [vmem:[#allocation7 + $0x68] ss:$16 sps:$4 sm:$0xff] (!%p1557_p1)  }
  0x97   : > { %789 = vmatpush1.bf16.msra.mxu0 (!%p1557_p1), %v1885_v6  ;;  %862 = vmatpush1.bf16.msra.mxu1 (!%p1557_p1), %v1886_v7  ;;  %v1899_v16 = vld [vmem:[#allocation7 + $0x84] ss:$16 sps:$4 sm:$0xff] (!%p1557_p1)   ;;  %v1901_v17 = vld [vmem:[#allocation7 + $0x8c] ss:$16 sps:$4 sm:$0xff] (!%p1557_p1)   ;;  %v1903_v18 = vld [vmem:[#allocation7 + $0x80] ss:$16 sps:$4 sm:$0xff] (!%p1557_p1)  }
  0x98   : > { %790 = vmatprep.subr.bf16.mxu0 (!%p1557_p1), %v1887_v8  ;;  %863 = vmatprep.subr.bf16.mxu1 (!%p1557_p1), %v1889_v9  ;;  %v1904_v19 = vld [vmem:[#allocation7 + $0x88] ss:$16 sps:$4 sm:$0xff] (!%p1557_p1)   ;;  %v1905_v20 = vld [vmem:[#allocation7 + $0xa4] ss:$16 sps:$4 sm:$0xff] (!%p1557_p1)   ;;  %v1907_v21 = vld [vmem:[#allocation7 + $0xac] ss:$16 sps:$4 sm:$0xff] (!%p1557_p1)  }
  0x99   : > { %v1909_v22 = vld [vmem:[#allocation7 + $0xa0] ss:$16 sps:$4 sm:$0xff]   ;;  %v1910_v23 = vld [vmem:[#allocation7 + $0xa8] ss:$16 sps:$4 sm:$0xff]   ;;  %v1911_v24 = vld [vmem:[#allocation7 + $0xc4] ss:$16 sps:$4 sm:$0xff]  }
  0x9a   : > { %v1913_v25 = vld [vmem:[#allocation7 + $0xcc] ss:$16 sps:$4 sm:$0xff]   ;;  %v1915_v26 = vld [vmem:[#allocation7 + $0xc0] ss:$16 sps:$4 sm:$0xff]   ;;  %v1916_v27 = vld [vmem:[#allocation7 + $0xc8] ss:$16 sps:$4 sm:$0xff]  }
  0x9b   : > { %791 = vmatpush1.bf16.msra.mxu0 %v1891_v10  ;;  %864 = vmatpush1.bf16.msra.mxu1 %v1892_v11  ;;  %v1917_v28 = vld [vmem:[#allocation7 + $0xe4] ss:$16 sps:$4 sm:$0xff]   ;;  %v1919_v29 = vld [vmem:[#allocation7 + $0xec] ss:$16 sps:$4 sm:$0xff]   ;;  %v1921_v30 = vld [vmem:[#allocation7 + $0xe0] ss:$16 sps:$4 sm:$0xff]  }
  0x9c   : > { %792 = vmatprep.subr.bf16.mxu0 %v1893_v12  ;;  %865 = vmatprep.subr.bf16.mxu1 %v1895_v13  ;;  %v1922_v31 = vld [vmem:[#allocation7 + $0xe8] ss:$16 sps:$4 sm:$0xff]   ;;  %v1923_v32 = vld [vmem:[#allocation7 + $0x104] ss:$16 sps:$4 sm:$0xff]   ;;  %v1925_v33 = vld [vmem:[#allocation7 + $0x10c] ss:$16 sps:$4 sm:$0xff]  }
  0x9d   : > { %v1927_v34 = vld [vmem:[#allocation7 + $0x100] ss:$16 sps:$4 sm:$0xff]   ;;  %v1928_v35 = vld [vmem:[#allocation7 + $0x108] ss:$16 sps:$4 sm:$0xff]   ;;  %v1929_v36 = vld [vmem:[#allocation7 + $0x124] ss:$16 sps:$4 sm:$0xff]  }
  0x9e   : > { %v1931_v37 = vld [vmem:[#allocation7 + $0x12c] ss:$16 sps:$4 sm:$0xff]   ;;  %v1933_v38 = vld [vmem:[#allocation7 + $0x120] ss:$16 sps:$4 sm:$0xff]   ;;  %v1934_v39 = vld [vmem:[#allocation7 + $0x128] ss:$16 sps:$4 sm:$0xff]  }
  0x9f   : > { %793 = vmatpush1.bf16.msra.mxu0 %v1897_v14  ;;  %866 = vmatpush1.bf16.msra.mxu1 %v1898_v15  ;;  %v1935_v40 = vld [vmem:[#allocation7 + $0x144] ss:$16 sps:$4 sm:$0xff]   ;;  %v1937_v41 = vld [vmem:[#allocation7 + $0x14c] ss:$16 sps:$4 sm:$0xff]   ;;  %v1939_v42 = vld [vmem:[#allocation7 + $0x140] ss:$16 sps:$4 sm:$0xff]  }
  0xa0   : > { %794 = vmatprep.subr.bf16.mxu0 %v1899_v16  ;;  %867 = vmatprep.subr.bf16.mxu1 %v1901_v17  ;;  %v1940_v43 = vld [vmem:[#allocation7 + $0x148] ss:$16 sps:$4 sm:$0xff]   ;;  %v1941_v44 = vld [vmem:[#allocation7 + $0x164] ss:$16 sps:$4 sm:$0xff]   ;;  %v1943_v45 = vld [vmem:[#allocation7 + $0x16c] ss:$16 sps:$4 sm:$0xff]  }
  0xa1   : > { %v260_v46 = vld [vmem:[%s2627_s26 + $0x8] sm:$0xff]  ;;  %v271_v47 = vld [vmem:[%s2627_s26 + $0x10] sm:$0xff]  ;;  %v259_v3 = vld [vmem:[%s2627_s26] sm:$0xff] }
  0xa2   : > { %v1945_v48 = vld [vmem:[#allocation7 + $0x160] ss:$16 sps:$4 sm:$0xff]   ;;  %v1946_v49 = vld [vmem:[#allocation7 + $0x168] ss:$16 sps:$4 sm:$0xff]   ;;  %v1686_v50 = vpack.c.bf16 %v271_v47, %v260_v46  ;;  %v1947_v51 = vld [vmem:[#allocation7 + $0x184] ss:$16 sps:$4 sm:$0xff]   ;;  %v1685_v6 = vpack.c.bf16 %v260_v46, %v259_v3 }
  0xa3   : > { %795 = vmatpush1.bf16.msra.mxu0 %v1903_v18  ;;  %868 = vmatpush1.bf16.msra.mxu1 %v1904_v19  ;;  %v1949_v52 = vld [vmem:[#allocation7 + $0x18c] ss:$16 sps:$4 sm:$0xff]   ;;  %v1951_v53 = vld [vmem:[#allocation7 + $0x180] ss:$16 sps:$4 sm:$0xff]   ;;  %v1952_v54 = vld [vmem:[#allocation7 + $0x188] ss:$16 sps:$4 sm:$0xff]  }
  0xa4   : > { %796 = vmatprep.subr.bf16.mxu0 %v1905_v20  ;;  %869 = vmatprep.subr.bf16.mxu1 %v1907_v21  ;;  %v1953_v55 = vld [vmem:[#allocation7 + $0x1a4] ss:$16 sps:$4 sm:$0xff]   ;;  %v1955_v56 = vld [vmem:[#allocation7 + $0x1ac] ss:$16 sps:$4 sm:$0xff]   ;;  %v1957_v57 = vld [vmem:[#allocation7 + $0x1a0] ss:$16 sps:$4 sm:$0xff]  }
  0xa5   : > { %818 = vmatprep.mubr.bf16.mxu0 %v1686_v50  ;;  %891 = vmatprep.mubr.bf16.mxu1 %v1686_v50  ;;  %v1958_v58 = vld [vmem:[#allocation7 + $0x1a8] ss:$16 sps:$4 sm:$0xff]   ;;  %v1959_v59 = vld [vmem:[#allocation7 + $0x1c4] ss:$16 sps:$4 sm:$0xff]   ;;  %v1961_v60 = vld [vmem:[#allocation7 + $0x1cc] ss:$16 sps:$4 sm:$0xff]  }
  0xa6   : > { %v1963_v61 = vld [vmem:[#allocation7 + $0x1c0] ss:$16 sps:$4 sm:$0xff]   ;;  %v1964_v62 = vld [vmem:[#allocation7 + $0x1c8] ss:$16 sps:$4 sm:$0xff]   ;;  %v1965_v63 = vld [vmem:[#allocation7 + $0x1e4] ss:$16 sps:$4 sm:$0xff]  }
  0xa7   : > { %797 = vmatpush1.bf16.msra.mxu0 %v1909_v22  ;;  %870 = vmatpush1.bf16.msra.mxu1 %v1910_v23  ;;  %v1967_v0 = vld [vmem:[#allocation7 + $0x1ec] ss:$16 sps:$4 sm:$0xff]   ;;  %v1969_v1 = vld [vmem:[#allocation7 + $0x1e0] ss:$16 sps:$4 sm:$0xff]   ;;  %v1970_v2 = vld [vmem:[#allocation7 + $0x1e8] ss:$16 sps:$4 sm:$0xff]  }
  0xa8   : > { %798 = vmatprep.subr.bf16.mxu0 %v1911_v24  ;;  %871 = vmatprep.subr.bf16.mxu1 %v1913_v25  ;;  %v283_v4 = vld [vmem:[%s2627_s26 + $0x18] sm:$0xff]  ;;  %v295_v5 = vld [vmem:[%s2627_s26 + $0x20] sm:$0xff]  ;;  %v307_v8 = vld [vmem:[%s2627_s26 + $0x28] sm:$0xff] }
  0xa9   : > { %v1688_v7 = vpack.c.bf16 %v295_v5, %v283_v4  ;;  %v319_v9 = vld [vmem:[%s2627_s26 + $0x30] sm:$0xff]  ;;  %v1687_v10 = vpack.c.bf16 %v283_v4, %v271_v47  ;;  %v331_v12 = vld [vmem:[%s2627_s26 + $0x38] sm:$0xff]  ;;  %v343_v13 = vld [vmem:[%s2627_s26 + $0x40] sm:$0xff]  ;;  %v1689_v14 = vpack.c.bf16 %v307_v8, %v295_v5 }
  0xaa   : > { %v1690_v11 = vpack.c.bf16 %v319_v9, %v307_v8  ;;  %v1692_v15 = vpack.c.bf16 %v343_v13, %v331_v12  ;;  %v1691_v16 = vpack.c.bf16 %v331_v12, %v319_v9 }
  0xab   : > { %799 = vmatpush1.bf16.msra.mxu0 %v1915_v26  ;;  %872 = vmatpush1.bf16.msra.mxu1 %v1916_v27 }
  0xac   : > { %800 = vmatprep.subr.bf16.mxu0 %v1917_v28  ;;  %873 = vmatprep.subr.bf16.mxu1 %v1919_v29 }
  0xaf   : > { %801 = vmatpush1.bf16.msra.mxu0 %v1921_v30  ;;  %874 = vmatpush1.bf16.msra.mxu1 %v1922_v31 }
  0xb0   : > { %802 = vmatprep.subr.bf16.mxu0 %v1923_v32  ;;  %875 = vmatprep.subr.bf16.mxu1 %v1925_v33 }
  0xb3   : > { %803 = vmatpush1.bf16.msra.mxu0 %v1927_v34  ;;  %876 = vmatpush1.bf16.msra.mxu1 %v1928_v35 }
  0xb4   : > { %804 = vmatprep.subr.bf16.mxu0 %v1929_v36  ;;  %877 = vmatprep.subr.bf16.mxu1 %v1931_v37 }
  0xb7   : > { %805 = vmatpush1.bf16.msra.mxu0 %v1933_v38  ;;  %878 = vmatpush1.bf16.msra.mxu1 %v1934_v39 }
  0xb8   : > { %806 = vmatprep.subr.bf16.mxu0 %v1935_v40  ;;  %879 = vmatprep.subr.bf16.mxu1 %v1937_v41 }
  0xbb   : > { %807 = vmatpush1.bf16.msra.mxu0 %v1939_v42  ;;  %880 = vmatpush1.bf16.msra.mxu1 %v1940_v43 }
  0xbc   : > { %808 = vmatprep.subr.bf16.mxu0 %v1941_v44  ;;  %881 = vmatprep.subr.bf16.mxu1 %v1943_v45 }
  0xbf   : > { %809 = vmatpush1.bf16.msra.mxu0 %v1945_v48  ;;  %882 = vmatpush1.bf16.msra.mxu1 %v1946_v49 }
  0xc0   : > { %810 = vmatprep.subr.bf16.mxu0 %v1947_v51  ;;  %883 = vmatprep.subr.bf16.mxu1 %v1949_v52 }
  0xc3   : > { %811 = vmatpush1.bf16.msra.mxu0 %v1951_v53  ;;  %884 = vmatpush1.bf16.msra.mxu1 %v1952_v54 }
  0xc4   : > { %812 = vmatprep.subr.bf16.mxu0 %v1953_v55  ;;  %885 = vmatprep.subr.bf16.mxu1 %v1955_v56 }
  0xc7   : > { %813 = vmatpush1.bf16.msra.mxu0 %v1957_v57  ;;  %886 = vmatpush1.bf16.msra.mxu1 %v1958_v58 }
  0xc8   : > { %814 = vmatprep.subr.bf16.mxu0 %v1959_v59  ;;  %887 = vmatprep.subr.bf16.mxu1 %v1961_v60 }
  0xcb   : > { %815 = vmatpush1.bf16.msra.mxu0 %v1963_v61  ;;  %888 = vmatpush1.bf16.msra.mxu1 %v1964_v62 }
  0xcc   : > { %816 = vmatprep.subr.bf16.mxu0 %v1965_v63  ;;  %889 = vmatprep.subr.bf16.mxu1 %v1967_v0 }
  0xcf   : > { %817 = vmatpush1.bf16.msra.mxu0 %v1969_v1  ;;  %890 = vmatpush1.bf16.msra.mxu1 %v1970_v2 }
  0xd2   : > { %819 = vmatmul.mubr.bf16.vlgmr.msra.gmra.mrb[0].mxu0 %v1685_v6  ;;  %892 = vmatmul.mubr.bf16.vlgmr.msra.gmra.mrb[0].mxu1 %v1685_v6 }
  0xd3   : > { %828 = vmatprep.mubr.bf16.mxu0 %v1688_v7  ;;  %901 = vmatprep.mubr.bf16.mxu1 %v1688_v7 }
  0xda   : > { %829 = vmatmul.mubr.bf16.gmra.mrb[4].mxu0 %v1687_v10  ;;  %902 = vmatmul.mubr.bf16.gmra.mrb[4].mxu1 %v1687_v10 }
  0xdb   : > { %838 = vmatprep.mubr.bf16.mxu0 %v1690_v11  ;;  %911 = vmatprep.mubr.bf16.mxu1 %v1690_v11 }
  0xe2   : > { %839 = vmatmul.mubr.bf16.gmra.mrb[8].mxu0 %v1689_v14  ;;  %912 = vmatmul.mubr.bf16.gmra.mrb[8].mxu1 %v1689_v14 }
  0xe3   : > { %848 = vmatprep.mubr.bf16.mxu0 %v1692_v15  ;;  %921 = vmatprep.mubr.bf16.mxu1 %v1692_v15 }
  0xea   : > { %849 = vmatmul.mubr.bf16.gmra.mrb[12].mxu0 %v1691_v16  ;;  %922 = vmatmul.mubr.bf16.gmra.mrb[12].mxu1 %v1691_v16 }
 0x1a5   : > { %v820_v17 = vpop.f32.mrb[0].mxu0  ;;  %v893_v18 = vpop.f32.mrb[0].mxu1 }
 0x1a6   : > { %v932_v19 = vmul.f32 %v820_v17, %v820_v17  ;;  %v948_v20 = vmul.f32 %v893_v18, %v893_v18  ;;  %v822_v21 = vpop.f32.mrb[1].mxu0  ;;  %v895_v22 = vpop.f32.mrb[1].mxu1 }
 0x1a7   : > { %v933_v23 = vmul.f32 %v822_v21, %v822_v21  ;;  %v949_v24 = vmul.f32 %v895_v22, %v895_v22  ;;  %v824_v25 = vpop.f32.mrb[2].mxu0  ;;  %v897_v26 = vpop.f32.mrb[2].mxu1 }
 0x1a8   : > { %v2659_v27 = vadd.f32 %v948_v20, %v932_v19  ;;  %v934_v28 = vmul.f32 %v824_v25, %v824_v25  ;;  %v950_v29 = vmul.f32 %v897_v26, %v897_v26  ;;  %v826_v30 = vpop.f32.mrb[3].mxu0  ;;  %v899_v31 = vpop.f32.mrb[3].mxu1 }
 0x1a9   : > { %v2661_v32 = vadd.f32 %v949_v24, %v933_v23  ;;  %v935_v33 = vmul.f32 %v826_v30, %v826_v30  ;;  %v951_v34 = vmul.f32 %v899_v31, %v899_v31 }
 0x1aa   : > { %1971 = vrsqrt.f32 %v2659_v27  ;;  %v2665_v35 = vadd.f32 %v950_v29, %v934_v28  ;;  %vm982_vm0 = vcmp.eq.f32.partialorder %v2659_v27, inf  ;;  %vm984_vm1 = vcmp.eq.f32.partialorder %v2659_v27, 0.0 }
 0x1ab   : > { %1973 = vrsqrt.f32 %v2661_v32  ;;  %v2667_v36 = vadd.f32 %v951_v34, %v935_v33  ;;  %v985_v58 = vand.u32 2147483648, %v2659_v27  ;;  %vm989_vm2 = vcmp.eq.f32.partialorder %v2661_v32, inf }
 0x1ac   : > { %1975 = vrsqrt.f32 %v2665_v35  ;;  %vm991_vm3 = vcmp.eq.f32.partialorder %v2661_v32, 0.0  ;;  %v992_v61 = vand.u32 2147483648, %v2661_v32  ;;  %vm996_vm4 = vcmp.eq.f32.partialorder %v2665_v35, inf }
 0x1ad   : > { %v830_v37 = vpop.f32.mrb[4].mxu0  ;;  %v903_v38 = vpop.f32.mrb[4].mxu1  ;;  %1977 = vrsqrt.f32 %v2667_v36  ;;  %vm998_vm5 = vcmp.eq.f32.partialorder %v2665_v35, 0.0  ;;  %v999_v3 = vand.u32 2147483648, %v2665_v35  ;;  %vm1003_vm6 = vcmp.eq.f32.partialorder %v2667_v36, inf }
 0x1ae   : > { %v832_v39 = vpop.f32.mrb[5].mxu0  ;;  %v905_v40 = vpop.f32.mrb[5].mxu1  ;;  %v936_v43 = vmul.f32 %v830_v37, %v830_v37  ;;  %v952_v44 = vmul.f32 %v903_v38, %v903_v38  ;;  %vm1005_vm7 = vcmp.eq.f32.partialorder %v2667_v36, 0.0  ;;  %v1006_v8 = vand.u32 2147483648, %v2667_v36 }
 0x1af   : > { %v834_v41 = vpop.f32.mrb[6].mxu0  ;;  %v907_v42 = vpop.f32.mrb[6].mxu1  ;;  %v937_v45 = vmul.f32 %v832_v39, %v832_v39  ;;  %v953_v46 = vmul.f32 %v905_v40, %v905_v40 }
 0x1b0   : > { %v836_v47 = vpop.f32.mrb[7].mxu0  ;;  %v909_v48 = vpop.f32.mrb[7].mxu1  ;;  %v938_v49 = vmul.f32 %v834_v41, %v834_v41  ;;  %v954_v50 = vmul.f32 %v907_v42, %v907_v42  ;;  %v2671_v53 = vadd.f32 %v952_v44, %v936_v43 }
 0x1b1   : > { %v939_v51 = vmul.f32 %v836_v47, %v836_v47  ;;  %v955_v52 = vmul.f32 %v909_v48, %v909_v48  ;;  %v2673_v54 = vadd.f32 %v953_v46, %v937_v45 }
 0x1b2   : > { %v2676_v55 = vadd.f32 %v954_v50, %v938_v49  ;;  %1979 = vrsqrt.f32 %v2671_v53  ;;  %vm1010_vm8 = vcmp.eq.f32.partialorder %v2671_v53, inf  ;;  %v1013_v9 = vand.u32 2147483648, %v2671_v53 }
 0x1b3   : > { %v2678_v56 = vadd.f32 %v955_v52, %v939_v51  ;;  %1981 = vrsqrt.f32 %v2673_v54  ;;  %vm1017_vm9 = vcmp.eq.f32.partialorder %v2673_v54, inf  ;;  %vm1012_vm10 = vcmp.eq.f32.partialorder %v2671_v53, 0.0 }
 0x1b4   : > { %v1972_v57 = vpop.eup %1971  ;;  %1983 = vrsqrt.f32 %v2676_v55  ;;  %vm1019_vm11 = vcmp.eq.f32.partialorder %v2673_v54, 0.0  ;;  %v1020_v38 = vand.u32 2147483648, %v2673_v54  ;;  %vm1024_vm12 = vcmp.eq.f32.partialorder %v2676_v55, inf }
 0x1b5   : > { %v1974_v59 = vpop.eup %1973  ;;  %v981_v60 = vmul.f32 %v1972_v57, %v2659_v27  ;;  %v840_v62 = vpop.f32.mrb[8].mxu0  ;;  %1985 = vrsqrt.f32 %v2678_v56  ;;  %vm1026_vm13 = vcmp.eq.f32.partialorder %v2676_v55, 0.0  ;;  %v1027_v52 = vand.u32 2147483648, %v2676_v55 }
 0x1b6   : > { %v913_v63 = vpop.f32.mrb[8].mxu1  ;;  %v988_v0 = vmul.f32 %v1974_v59, %v2661_v32  ;;  %v842_v1 = vpop.f32.mrb[9].mxu0  ;;  %v940_v15 = vmul.f32 %v840_v62, %v840_v62  ;;  %vm1031_vm14 = vcmp.eq.f32.partialorder %v2678_v56, inf  ;;  %vm1033_vm15 = vcmp.eq.f32.partialorder %v2678_v56, 0.0 }
 0x1b7   : > { %v915_v2 = vpop.f32.mrb[9].mxu1  ;;  %v844_v4 = vpop.f32.mrb[10].mxu0  ;;  %v983_v7 = vsel %vm982_vm0, %v2659_v27, %v981_v60  ;;  %v956_v17 = vmul.f32 %v913_v63, %v913_v63  ;;  %v941_v18 = vmul.f32 %v842_v1, %v842_v1  ;;  %v1034_v59 = vand.u32 2147483648, %v2678_v56 }
 0x1b8   : > { %v917_v5 = vpop.f32.mrb[10].mxu1  ;;  %v1976_v6 = vpop.eup %1975  ;;  %v990_v13 = vsel %vm989_vm2, %v2661_v32, %v988_v0  ;;  %v957_v19 = vmul.f32 %v915_v2, %v915_v2  ;;  %v986_v20 = vsel %vm984_vm1, %v985_v58, %v983_v7  ;;  %v942_v22 = vmul.f32 %v844_v4, %v844_v4 }
 0x1b9   : > { %v846_v10 = vpop.f32.mrb[11].mxu0  ;;  %v919_v11 = vpop.f32.mrb[11].mxu1  ;;  %v995_v14 = vmul.f32 %v1976_v6, %v2665_v35  ;;  %v958_v23 = vmul.f32 %v917_v5, %v917_v5  ;;  %v2719_v26 = vadd.f32 %v956_v17, %v940_v15  ;;  %v993_v27 = vsel %vm991_vm3, %v992_v61, %v990_v13 }
 0x1ba   : > { %v1978_v12 = vpop.eup %1977  ;;  %v2721_v28 = vadd.f32 %v957_v19, %v941_v18  ;;  %v959_v42 = vmul.f32 %v919_v11, %v919_v11 }
 0x1bb   : > { %v1002_v16 = vmul.f32 %v1978_v12, %v2667_v36  ;;  %v997_v21 = vsel %vm996_vm4, %v2665_v35, %v995_v14  ;;  %v2727_v31 = vadd.f32 %v958_v23, %v942_v22  ;;  %1987 = vrsqrt.f32 %v2719_v26 }
 0x1bc   : > { %v1000_v24 = vsel %vm998_vm5, %v999_v3, %v997_v21  ;;  %v1980_v35 = vpop.eup %1979  ;;  %1989 = vrsqrt.f32 %v2721_v28  ;;  %vm1038_vm0 = vcmp.eq.f32.partialorder %v2719_v26, inf  ;;  %v1041_v18 = vand.u32 2147483648, %v2719_v26 }
 0x1bd   : > { %v1004_v25 = vsel %vm1003_vm6, %v2667_v36, %v1002_v16  ;;  %v1092_v29 = vpack.c.bf16 %v1000_v24, %v986_v20  ;;  %v850_v33 = vpop.f32.mrb[12].mxu0  ;;  %v923_v34 = vpop.f32.mrb[12].mxu1  ;;  %v1009_v41 = vmul.f32 %v1980_v35, %v2671_v53  ;;  %v943_v36 = vmul.f32 %v846_v10, %v846_v10 }
 0x1be   : > { %v1007_v30 = vsel %vm1005_vm7, %v1006_v8, %v1004_v25  ;;  %v852_v39 = vpop.f32.mrb[13].mxu0  ;;  %v925_v40 = vpop.f32.mrb[13].mxu1  ;;  %1991 = vrsqrt.f32 %v2727_v31  ;;  %v944_v63 = vmul.f32 %v850_v33, %v850_v33  ;;  %v960_v3 = vmul.f32 %v923_v34, %v923_v34 }
 0x1bf   : > { %v1093_v37 = vpack.c.bf16 %v1007_v30, %v993_v27  ;;  %v1982_v32 = vpop.eup %1981  ;;  %1100 = vst [vmem:[#allocation3] sm:$0xff] %v1092_v29  ;;  %v854_v43 = vpop.f32.mrb[14].mxu0  ;;  %v1011_v50 = vsel %vm1010_vm8, %v2671_v53, %v1009_v41  ;;  %v975_v62 = vadd.f32 %v959_v42, %v943_v36  ;;  %v945_v6 = vmul.f32 %v852_v39, %v852_v39 }
 0x1c0   : > { %v927_v44 = vpop.f32.mrb[14].mxu1  ;;  %v1984_v45 = vpop.eup %1983  ;;  %v1016_v46 = vmul.f32 %v1982_v32, %v2673_v54  ;;  %v1014_v60 = vsel %vm1012_vm10, %v1013_v9, %v1011_v50  ;;  %v2758_v53 = vadd.f32 %v960_v3, %v944_v63  ;;  %v961_v8 = vmul.f32 %v925_v40, %v925_v40 }
 0x1c1   : > { %1101 = vst [vmem:[#allocation3 + $0x8] sm:$0xff] %v1093_v37  ;;  %v856_v47 = vpop.f32.mrb[15].mxu0  ;;  %v929_v48 = vpop.f32.mrb[15].mxu1  ;;  %v1023_v51 = vmul.f32 %v1984_v45, %v2676_v55  ;;  %1993 = vrsqrt.f32 %v975_v62  ;;  %v946_v9 = vmul.f32 %v854_v43, %v854_v43  ;;  %v962_v10 = vmul.f32 %v927_v44, %v927_v44 }
 0x1c2   : > { %v1986_v49 = vpop.eup %1985  ;;  %v1018_v57 = vsel %vm1017_vm9, %v2673_v54, %v1016_v46  ;;  %1995 = vrsqrt.f32 %v2758_v53  ;;  %v947_v14 = vmul.f32 %v856_v47, %v856_v47  ;;  %v963_v15 = vmul.f32 %v929_v48, %v929_v48 }
 0x1c3   : > { %v1030_v58 = vmul.f32 %v1986_v49, %v2678_v56  ;;  %v1025_v61 = vsel %vm1024_vm12, %v2676_v55, %v1023_v51  ;;  %v1021_v0 = vsel %vm1019_vm11, %v1020_v38, %v1018_v57  ;;  %v978_v12 = vadd.f32 %v962_v10, %v946_v9 }
 0x1c4   : > { %v1028_v1 = vsel %vm1026_vm13, %v1027_v52, %v1025_v61  ;;  %vm1052_vm1 = vcmp.eq.f32.partialorder %v2727_v31, inf  ;;  %v1055_v20 = vand.u32 2147483648, %v2727_v31  ;;  %vm1040_vm2 = vcmp.eq.f32.partialorder %v2719_v26, 0.0 }
 0x1c5   : > { %v1032_v2 = vsel %vm1031_vm14, %v2678_v56, %v1030_v58  ;;  %v1094_v4 = vpack.c.bf16 %v1028_v1, %v1014_v60  ;;  %v1988_v11 = vpop.eup %1987  ;;  %v2762_v56 = vadd.f32 %v961_v8, %v945_v6  ;;  %vm1054_vm3 = vcmp.eq.f32.partialorder %v2727_v31, 0.0 }
 0x1c6   : > { %v1035_v5 = vsel %vm1033_vm15, %v1034_v59, %v1032_v2  ;;  %v1990_v54 = vpop.eup %1989  ;;  %v1037_v55 = vmul.f32 %v1988_v11, %v2719_v26  ;;  %v979_v24 = vadd.f32 %v963_v15, %v947_v14  ;;  %vm1045_vm4 = vcmp.eq.f32.partialorder %v2721_v28, inf }
 0x1c7   : > { %v1095_v7 = vpack.c.bf16 %v1035_v5, %v1021_v0  ;;  %1102 = vst [vmem:[#allocation3 + $0x10] sm:$0xff] %v1094_v4  ;;  %1997 = vrsqrt.f32 %v2762_v56  ;;  %v1044_v19 = vmul.f32 %v1990_v54, %v2721_v28  ;;  %v1048_v33 = vand.u32 2147483648, %v2721_v28 }
 0x1c8   : > { %v1992_v13 = vpop.eup %1991  ;;  %v1039_v16 = vsel %vm1038_vm0, %v2719_v26, %v1037_v55  ;;  %1999 = vrsqrt.f32 %v978_v12  ;;  %vm1059_vm5 = vcmp.eq.f32.partialorder %v975_v62, inf  ;;  %v1062_v26 = vand.u32 2147483648, %v975_v62 }
 0x1c9   : > { %1103 = vst [vmem:[#allocation3 + $0x18] sm:$0xff] %v1095_v7  ;;  %v1051_v17 = vmul.f32 %v1992_v13, %v2727_v31  ;;  %v1042_v22 = vsel %vm1040_vm2, %v1041_v18, %v1039_v16  ;;  %v1046_v29 = vsel %vm1045_vm4, %v2721_v28, %v1044_v19  ;;  %2001 = vrsqrt.f32 %v979_v24 }
 0x1ca   : > { %vm1047_vm6 = vcmp.eq.f32.partialorder %v2721_v28, 0.0  ;;  %vm1061_vm7 = vcmp.eq.f32.partialorder %v975_v62, 0.0  ;;  %vm1066_vm8 = vcmp.eq.f32.partialorder %v2758_v53, inf  ;;  %v1069_v43 = vand.u32 2147483648, %v2758_v53 }
 0x1cb   : > { %v1053_v21 = vsel %vm1052_vm1, %v2727_v31, %v1051_v17  ;;  %v1994_v25 = vpop.eup %1993  ;;  %v1049_v35 = vsel %vm1047_vm6, %v1048_v33, %v1046_v29  ;;  %vm1080_vm9 = vcmp.eq.f32.partialorder %v978_v12, inf  ;;  %v1083_v28 = vand.u32 2147483648, %v978_v12 }
 0x1cc   : > { %v1056_v23 = vsel %vm1054_vm3, %v1055_v20, %v1053_v21  ;;  %v1058_v30 = vmul.f32 %v1994_v25, %v975_v62  ;;  %v1996_v34 = vpop.eup %1995  ;;  %vm1068_vm10 = vcmp.eq.f32.partialorder %v2758_v53, 0.0  ;;  %vm1073_vm11 = vcmp.eq.f32.partialorder %v2762_v56, inf }
 0x1cd   : > { %v1096_v27 = vpack.c.bf16 %v1056_v23, %v1042_v22  ;;  %v1065_v39 = vmul.f32 %v1996_v34, %v2758_v53  ;;  %vm1082_vm12 = vcmp.eq.f32.partialorder %v978_v12, 0.0  ;;  %v1076_v50 = vand.u32 2147483648, %v2762_v56 }
 0x1ce   : > { %v1060_v31 = vsel %vm1059_vm5, %v975_v62, %v1058_v30  ;;  %vm1087_vm13 = vcmp.eq.f32.partialorder %v979_v24, inf  ;;  %v1090_v52 = vand.u32 2147483648, %v979_v24  ;;  %vm1075_vm14 = vcmp.eq.f32.partialorder %v2762_v56, 0.0 }
 0x1cf   : > { %1104 = vst [vmem:[#allocation3 + $0x20] sm:$0xff] %v1096_v27  ;;  %v1063_v37 = vsel %vm1061_vm7, %v1062_v26, %v1060_v31  ;;  %v1067_v36 = vsel %vm1066_vm8, %v2758_v53, %v1065_v39  ;;  %vm1089_vm15 = vcmp.eq.f32.partialorder %v979_v24, 0.0 }
 0x1d0   : > { %v1097_v38 = vpack.c.bf16 %v1063_v37, %v1049_v35  ;;  %v1070_v46 = vsel %vm1068_vm10, %v1069_v43, %v1067_v36 }
 0x1d1   : > { %v1998_v40 = vpop.eup %1997 }
 0x1d2   : > { %1105 = vst [vmem:[#allocation3 + $0x28] sm:$0xff] %v1097_v38  ;;  %v2000_v32 = vpop.eup %1999  ;;  %v1072_v41 = vmul.f32 %v1998_v40, %v2762_v56 }
 0x1d3   : > { %v1079_v42 = vmul.f32 %v2000_v32, %v978_v12  ;;  %v2002_v44 = vpop.eup %2001 }
 0x1d4   : > { %v1074_v47 = vsel %vm1073_vm11, %v2762_v56, %v1072_v41  ;;  %v1086_v49 = vmul.f32 %v2002_v44, %v979_v24 }
 0x1d5   : > { %v1081_v45 = vsel %vm1080_vm9, %v978_v12, %v1079_v42  ;;  %v1077_v58 = vsel %vm1075_vm14, %v1076_v50, %v1074_v47 }
 0x1d6   : > { %v1084_v48 = vsel %vm1082_vm12, %v1083_v28, %v1081_v45  ;;  %v1088_v57 = vsel %vm1087_vm13, %v979_v24, %v1086_v49 }
 0x1d7   : > { %v1098_v51 = vpack.c.bf16 %v1084_v48, %v1070_v46  ;;  %v1091_v59 = vsel %vm1089_vm15, %v1090_v52, %v1088_v57 }
 0x1d8   : > { %v1099_v60 = vpack.c.bf16 %v1091_v59, %v1077_v58 }
 0x1d9   : > { %1106 = vst [vmem:[#allocation3 + $0x30] sm:$0xff] %v1098_v51 }
 0x1da   : > { %1107 = vst [vmem:[#allocation3 + $0x38] sm:$0xff] %v1099_v60 }
 0x1db PF: > { %v2003_v61 = vld [vmem:[%s2638_s9 + $0x4] ss:$8 sps:$4 sm:$0xff]   ;;  %v2005_v62 = vld [vmem:[%s2638_s9] ss:$8 sps:$4 sm:$0xff]   ;;  %v2006_v63 = vld [vmem:[%s2638_s9 + $0x14] ss:$8 sps:$4 sm:$0xff]  }
 0x1dc   : > { %1308 = vmatprep.subr.bf16.mxu0 %v2003_v61  ;;  %1693 = vmatprep.subr.bf16.mxu1 %v2003_v61  ;;  %v2008_v0 = vld [vmem:[%s2638_s9 + $0x10] ss:$8 sps:$4 sm:$0xff]   ;;  %v2009_v1 = vld [vmem:[%s2638_s9 + $0x24] ss:$8 sps:$4 sm:$0xff]   ;;  %v2011_v2 = vld [vmem:[%s2638_s9 + $0x20] ss:$8 sps:$4 sm:$0xff]  }
 0x1dd   : > { %1309 = vmatpush1.bf16.msra.mxu0 %v2005_v62  ;;  %1709 = vmatpush1.bf16.msra.mxu1 %v2005_v62  ;;  %v2012_v3 = vld [vmem:[%s2638_s9 + $0x34] ss:$8 sps:$4 sm:$0xff]   ;;  %v2014_v4 = vld [vmem:[%s2638_s9 + $0x30] ss:$8 sps:$4 sm:$0xff]   ;;  %v2015_v5 = vld [vmem:[%s2638_s9 + $0x44] ss:$8 sps:$4 sm:$0xff]  }
 0x1de   : > { %1310 = vmatprep.subr.bf16.mxu0 %v2006_v63  ;;  %1694 = vmatprep.subr.bf16.mxu1 %v2006_v63  ;;  %v2017_v6 = vld [vmem:[%s2638_s9 + $0x40] ss:$8 sps:$4 sm:$0xff]   ;;  %v2018_v7 = vld [vmem:[%s2638_s9 + $0x54] ss:$8 sps:$4 sm:$0xff]   ;;  %v2020_v53 = vld [vmem:[%s2638_s9 + $0x50] ss:$8 sps:$4 sm:$0xff]  }
 0x1df   : > { %v2021_v8 = vld [vmem:[%s2638_s9 + $0x64] ss:$8 sps:$4 sm:$0xff]   ;;  %v1109_v9 = vld [vmem:[#allocation3 + $0x8] sm:$0xff]  ;;  %v2023_v11 = vld [vmem:[%s2638_s9 + $0x60] ss:$8 sps:$4 sm:$0xff]   ;;  %s1671_s24 = sshll.u32 %s2309_s21, 1 }
 0x1e0   : > { %1340 = vmatprep.mubr.bf16.mxu0 %v1109_v9  ;;  %v1113_v10 = vld [vmem:[#allocation3 + $0x28] sm:$0xff]  ;;  %v2027_v56 = vld [vmem:[%s2638_s9 + $0x84] ss:$8 sps:$4 sm:$0xff]   ;;  %v2029_v12 = vld [vmem:[%s2638_s9 + $0x80] ss:$8 sps:$4 sm:$0xff]   ;;  %s1672_s7 = sshll.u32 %s2313_s22, 3 }
 0x1e1   : > { %1311 = vmatpush1.bf16.msra.mxu0 %v2008_v0  ;;  %1710 = vmatpush1.bf16.msra.mxu1 %v2008_v0  ;;  %v2024_v54 = vld [vmem:[%s2638_s9 + $0x74] ss:$8 sps:$4 sm:$0xff]   ;;  %v2026_v55 = vld [vmem:[%s2638_s9 + $0x70] ss:$8 sps:$4 sm:$0xff]   ;;  %v2033_v15 = vld [vmem:[%s2638_s9 + $0xa4] ss:$8 sps:$4 sm:$0xff]   ;;  %s1426_s20 = sadd.s32 %s1672_s7, %s1671_s24 }
 0x1e2   : > { %1312 = vmatprep.subr.bf16.mxu0 %v2009_v1  ;;  %1695 = vmatprep.subr.bf16.mxu1 %v2009_v1  ;;  %v2030_v13 = vld [vmem:[%s2638_s9 + $0x94] ss:$8 sps:$4 sm:$0xff]   ;;  %v2032_v14 = vld [vmem:[%s2638_s9 + $0x90] ss:$8 sps:$4 sm:$0xff]   ;;  %v2035_v16 = vld [vmem:[%s2638_s9 + $0xa0] ss:$8 sps:$4 sm:$0xff]  }
 0x1e3   : > { %1360 = vmatprep.mubr.bf16.mxu1 %v1113_v10  ;;  %v2036_v17 = vld [vmem:[%s2638_s9 + $0xb4] ss:$8 sps:$4 sm:$0xff]   ;;  %v2038_v18 = vld [vmem:[%s2638_s9 + $0xb0] ss:$8 sps:$4 sm:$0xff]   ;;  %v2039_v19 = vld [vmem:[%s2638_s9 + $0xc4] ss:$8 sps:$4 sm:$0xff]  }
 0x1e4   : > { %v2041_v20 = vld [vmem:[%s2638_s9 + $0xc0] ss:$8 sps:$4 sm:$0xff]   ;;  %v2042_v21 = vld [vmem:[%s2638_s9 + $0xd4] ss:$8 sps:$4 sm:$0xff]   ;;  %v2044_v22 = vld [vmem:[%s2638_s9 + $0xd0] ss:$8 sps:$4 sm:$0xff]  }
 0x1e5   : > { %1313 = vmatpush1.bf16.msra.mxu0 %v2011_v2  ;;  %1711 = vmatpush1.bf16.msra.mxu1 %v2011_v2  ;;  %v2045_v23 = vld [vmem:[%s2638_s9 + $0xe4] ss:$8 sps:$4 sm:$0xff]   ;;  %v2047_v24 = vld [vmem:[%s2638_s9 + $0xe0] ss:$8 sps:$4 sm:$0xff]   ;;  %v2048_v25 = vld [vmem:[%s2638_s9 + $0xf4] ss:$8 sps:$4 sm:$0xff]  }
 0x1e6   : > { %1314 = vmatprep.subr.bf16.mxu0 %v2012_v3  ;;  %1696 = vmatprep.subr.bf16.mxu1 %v2012_v3  ;;  %v2050_v27 = vld [vmem:[%s2638_s9 + $0xf0] ss:$8 sps:$4 sm:$0xff]   ;;  %v1111_v33 = vld [vmem:[#allocation3 + $0x18] sm:$0xff]  ;;  %v1110_v34 = vld [vmem:[#allocation3 + $0x10] sm:$0xff]  ;;  %s1673_s11 = sshll.u32 %s1426_s20, 7  ;;  %s1430_s28 = sshll.u32 %s2647_s15, 4  ;;  %s2829_s28 = int_to_ptr.vmem [resolvable:$true] %s1430_s28 }
 0x1e7   : > { %v1108_v29 = vld [vmem:[#allocation3] sm:$0xff]  ;;  %v1115_v26 = vld [vmem:[#allocation3 + $0x38] sm:$0xff]  ;;  %v1114_v31 = vld [vmem:[#allocation3 + $0x30] sm:$0xff]  ;;  %s2960_s27 = sld [smem:[#allocation28_spill]]  ;;  %s1414_s5 = scalar_lea.sflag [#allocation6], %s250_s8 }
 0x1e8   : > { %v1112_v30 = vld [vmem:[#allocation3 + $0x20] sm:$0xff]  ;;  %s2171_s14 = scalar_lea.vmem %s2829_s28, 256  ;;  %p2961_p6 = scmp.ne.s32.totalorder %s2949_s29, 0 }
 0x1e9   : > { %1315 = vmatpush1.bf16.msra.mxu0 %v2014_v4  ;;  %1712 = vmatpush1.bf16.msra.mxu1 %v2014_v4  ;;  %p2172_p3 = scmp.ne.s32.totalorder %s2829_s28, %s2171_s14  ;;  %s2335_s12 = smov [#allocation10]  }
 0x1ea   : > { %1316 = vmatprep.subr.bf16.mxu0 %v2015_v5  ;;  %1697 = vmatprep.subr.bf16.mxu1 %v2015_v5  ;;  %s2175_s17 = sshll.u32 %s2335_s12, 4  ;;  %s2176_s17 = int_to_ptr.vmem [resolvable:$false] %s2175_s17 }
 0x1eb   : > { %p2173_p7 = pnand %p2172_p3, %p2961_p6  ;;  %s2177_s23 = scalar_lea.vmem %s2176_s17, 512 }
 0x1ec   : > { %p2178_p4 = scmp.lt.s32.totalorder %s2829_s28, %s2176_s17  ;;  %p2179_p11 = scmp.lt.s32.totalorder %s2177_s23, %s2171_s14 }
 0x1ed   : > { %1317 = vmatpush1.bf16.msra.mxu0 %v2017_v6  ;;  %1713 = vmatpush1.bf16.msra.mxu1 %v2017_v6  ;;  %s2827_s6 = scalar_lea.hbm %s2960_s27, %s1673_s11  ;;  %p2174_p9 = pneg %p2173_p7 }
 0x1ee   : > { %1318 = vmatprep.subr.bf16.mxu0 %v2018_v7  ;;  %1698 = vmatprep.subr.bf16.mxu1 %v2018_v7  ;;  %p2180_p8 = por %p2179_p11, %p2178_p4 }
 0x1f0   : > { %p2181_p5 = pnand %p2180_p8, %p2174_p9 }
 0x1f1   : > { %1319 = vmatpush1.bf16.msra.mxu0 %v2020_v53  ;;  %1714 = vmatpush1.bf16.msra.mxu1 %v2020_v53 }
 0x1f2   : > { %1320 = vmatprep.subr.bf16.mxu0 %v2021_v8  ;;  %1699 = vmatprep.subr.bf16.mxu1 %v2021_v8 }
 0x1f5   : > { %1321 = vmatpush1.bf16.msra.mxu0 %v2023_v11  ;;  %1715 = vmatpush1.bf16.msra.mxu1 %v2023_v11 }
 0x1f6   : > { %1322 = vmatprep.subr.bf16.mxu0 %v2024_v54  ;;  %1700 = vmatprep.subr.bf16.mxu1 %v2024_v54 }
 0x1f9   : > { %1323 = vmatpush1.bf16.msra.mxu0 %v2026_v55  ;;  %1716 = vmatpush1.bf16.msra.mxu1 %v2026_v55 }
 0x1fa   : > { %1324 = vmatprep.subr.bf16.mxu0 %v2027_v56  ;;  %1701 = vmatprep.subr.bf16.mxu1 %v2027_v56 }
 0x1fd   : > { %1325 = vmatpush1.bf16.msra.mxu0 %v2029_v12  ;;  %1717 = vmatpush1.bf16.msra.mxu1 %v2029_v12 }
 0x1fe   : > { %1326 = vmatprep.subr.bf16.mxu0 %v2030_v13  ;;  %1702 = vmatprep.subr.bf16.mxu1 %v2030_v13 }
 0x201   : > { %1327 = vmatpush1.bf16.msra.mxu0 %v2032_v14  ;;  %1718 = vmatpush1.bf16.msra.mxu1 %v2032_v14 }
 0x202   : > { %1328 = vmatprep.subr.bf16.mxu0 %v2033_v15  ;;  %1703 = vmatprep.subr.bf16.mxu1 %v2033_v15 }
 0x205   : > { %1329 = vmatpush1.bf16.msra.mxu0 %v2035_v16  ;;  %1719 = vmatpush1.bf16.msra.mxu1 %v2035_v16 }
 0x206   : > { %1330 = vmatprep.subr.bf16.mxu0 %v2036_v17  ;;  %1704 = vmatprep.subr.bf16.mxu1 %v2036_v17 }
 0x209   : > { %1331 = vmatpush1.bf16.msra.mxu0 %v2038_v18  ;;  %1720 = vmatpush1.bf16.msra.mxu1 %v2038_v18 }
 0x20a   : > { %1332 = vmatprep.subr.bf16.mxu0 %v2039_v19  ;;  %1705 = vmatprep.subr.bf16.mxu1 %v2039_v19 }
 0x20d   : > { %1333 = vmatpush1.bf16.msra.mxu0 %v2041_v20  ;;  %1721 = vmatpush1.bf16.msra.mxu1 %v2041_v20 }
 0x20e   : > { %1334 = vmatprep.subr.bf16.mxu0 %v2042_v21  ;;  %1706 = vmatprep.subr.bf16.mxu1 %v2042_v21 }
 0x211   : > { %1335 = vmatpush1.bf16.msra.mxu0 %v2044_v22  ;;  %1722 = vmatpush1.bf16.msra.mxu1 %v2044_v22 }
 0x212   : > { %1336 = vmatprep.subr.bf16.mxu0 %v2045_v23  ;;  %1707 = vmatprep.subr.bf16.mxu1 %v2045_v23 }
 0x215   : > { %1337 = vmatpush1.bf16.msra.mxu0 %v2047_v24  ;;  %1723 = vmatpush1.bf16.msra.mxu1 %v2047_v24 }
 0x216   : > { %1338 = vmatprep.subr.bf16.mxu0 %v2048_v25  ;;  %1708 = vmatprep.subr.bf16.mxu1 %v2048_v25 }
 0x219   : > { %1339 = vmatpush1.bf16.msra.mxu0 %v2050_v27  ;;  %1724 = vmatpush1.bf16.msra.mxu1 %v2050_v27 }
 0x21c   : > { %1341 = vmatmul.mubr.bf16.vlgmr.msra.gmra.mrb[0].mxu0 %v1108_v29  ;;  %1361 = vmatmul.mubr.bf16.vlgmr.msra.gmra.mrb[0].mxu1 %v1112_v30 }
 0x21d   : > { %1350 = vmatprep.mubr.bf16.mxu0 %v1111_v33  ;;  %1370 = vmatprep.mubr.bf16.mxu1 %v1115_v26 }
 0x224   : > { %1351 = vmatmul.mubr.bf16.gmra.mrb[4].mxu0 %v1110_v34  ;;  %1371 = vmatmul.mubr.bf16.gmra.mrb[4].mxu1 %v1114_v31 }
 0x2ef   : > { %v1342_v35 = vpop.f32.mrb[0].mxu0  ;;  %v1362_v37 = vpop.f32.mrb[0].mxu1 }
 0x2f0   : > { %2051 = vtanh.f32 %v1342_v35  ;;  %v1344_v38 = vpop.f32.mrb[1].mxu0  ;;  %v1364_v39 = vpop.f32.mrb[1].mxu1 }
 0x2f1   : > { %2053 = vtanh.f32 %v1344_v38  ;;  %v1346_v40 = vpop.f32.mrb[2].mxu0  ;;  %v1366_v32 = vpop.f32.mrb[2].mxu1 }
 0x2f2   : > { %2055 = vtanh.f32 %v1346_v40  ;;  %v1348_v41 = vpop.f32.mrb[3].mxu0  ;;  %v1368_v36 = vpop.f32.mrb[3].mxu1 }
 0x2f3   : > { %2057 = vtanh.f32 %v1348_v41 }
 0x2f4   : > { %2059 = vtanh.f32 %v1362_v37 }
 0x2f5   : > { %2061 = vtanh.f32 %v1364_v39 }
 0x2f7   : > { %v1352_v42 = vpop.f32.mrb[4].mxu0  ;;  %v1372_v43 = vpop.f32.mrb[4].mxu1 }
 0x2f8   : > { %2063 = vtanh.f32 %v1352_v42  ;;  %v1354_v28 = vpop.f32.mrb[5].mxu0  ;;  %v1374_v44 = vpop.f32.mrb[5].mxu1 }
 0x2f9   : > { %2065 = vtanh.f32 %v1354_v28  ;;  %v1356_v45 = vpop.f32.mrb[6].mxu0  ;;  %v1376_v46 = vpop.f32.mrb[6].mxu1 }
 0x2fa   : > { %v2052_v47 = vpop.eup %2051  ;;  %2067 = vtanh.f32 %v1356_v45  ;;  %v1358_v48 = vpop.f32.mrb[7].mxu0 }
 0x2fb   : > { %v1378_v49 = vpop.f32.mrb[7].mxu1  ;;  %v2054_v50 = vpop.eup %2053  ;;  %2069 = vtanh.f32 %v1358_v48 }
 0x2fc   : > { %v2056_v51 = vpop.eup %2055  ;;  %2071 = vtanh.f32 %v1366_v32 }
 0x2fd   : > { %v2058_v52 = vpop.eup %2057  ;;  %v1397_v57 = vadd.f32 %v2056_v51, %v2052_v47  ;;  %2073 = vtanh.f32 %v1368_v36 }
 0x2fe   : > { %v1404_v58 = vadd.f32 %v2058_v52, %v2054_v50  ;;  %2075 = vtanh.f32 %v1372_v43  ;;  %v2060_v59 = vpop.eup %2059 }
 0x2ff   : > { %2077 = vtanh.f32 %v1374_v44  ;;  %v2062_v60 = vpop.eup %2061 }
 0x300   : > { %2079 = vtanh.f32 %v1376_v46 }
 0x301   : > { %2081 = vtanh.f32 %v1378_v49 }
 0x302   : > { %v2064_v61 = vpop.eup %2063 }
 0x303   : > { %v2066_v62 = vpop.eup %2065  ;;  %v1398_v63 = vadd.f32 %v2064_v61, %v1397_v57 }
 0x304   : > { %v2068_v0 = vpop.eup %2067  ;;  %v1405_v1 = vadd.f32 %v2066_v62, %v1404_v58 }
 0x305   : > { %v2070_v2 = vpop.eup %2069  ;;  %v1399_v3 = vadd.f32 %v2068_v0, %v1398_v63 }
 0x306   : > { %v2072_v4 = vpop.eup %2071  ;;  %v1406_v5 = vadd.f32 %v2070_v2, %v1405_v1 }
 0x307   : > { %v2074_v6 = vpop.eup %2073  ;;  %v1400_v7 = vadd.f32 %v2060_v59, %v1399_v3 }
 0x308   : > { %v2076_v53 = vpop.eup %2075  ;;  %v1407_v8 = vadd.f32 %v2062_v60, %v1406_v5 }
 0x309   : > { %v2078_v9 = vpop.eup %2077  ;;  %v1401_v10 = vadd.f32 %v2072_v4, %v1400_v7 }
 0x30a   : > { %v1408_v11 = vadd.f32 %v2074_v6, %v1407_v8  ;;  %v2080_v55 = vpop.eup %2079 }
 0x30b   : > { %v1402_v54 = vadd.f32 %v2076_v53, %v1401_v10  ;;  %v2082_v12 = vpop.eup %2081 }
 0x30c   : > { %v1409_v56 = vadd.f32 %v2078_v9, %v1408_v11 }
 0x30d   : > { %v1403_v13 = vadd.f32 %v2080_v55, %v1402_v54 }
 0x30e   : > { %v1410_v14 = vadd.f32 %v2082_v12, %v1409_v56 }
 0x30f   : > { %1411 = vst [vmem:[%s2647_s15] sm:$0xff] %v1403_v13 }
 0x310   : > { %1412 = vst [vmem:[%s2647_s15 + $0x8] sm:$0xff] %v1410_v14 }
 0x311   : > { %2184 = shalt.err (!%p2181_p5)
}
 0x312   : > { %s2185_s10 = scalar_lea.hbm %s2827_s6, 256  ;;  %s2189_s26 = scalar_lea.hbm %s2960_s27, 2048 }
 0x313   : > { %p2186_p10 = scmp.ne.s32.totalorder %s2827_s6, %s2185_s10  ;;  %p2190_p0 = scmp.lt.u32.totalorder %s2827_s6, %s2960_s27 }
 0x314   : > { %p2191_p13 = scmp.lt.u32.totalorder %s2189_s26, %s2185_s10  ;;  %p2193_p3 = scmp.lt.u32.totalorder %s2185_s10, %s2827_s6 }
 0x315   : > { %p2187_p12 = pnand %p2186_p10, %p2961_p6 }
 0x316   : > { %p2192_p1 = por %p2191_p13, %p2190_p0 }
 0x317   : > { %p2188_p2 = pneg %p2187_p12 }
 0x318   : > { %p2194_p7 = por %p2193_p3, %p2192_p1 }
 0x31a   : > { %p2195_p9 = pnand %p2194_p7, %p2188_p2 }
 0x31c   : > { %2198 = shalt.err (!%p2195_p9)
}
 0x31d   : > { %1736 = dma.vmem_to_hbm [thread:$0]  (%p2961_p6), %s2829_s28, 256, %s2827_s6, %s1414_s5  }
 0x31e PF: > { %s2962_s9 = sld [smem:[#allocation15_spill]]  ;;  %s2963_s8 = sld [smem:[#allocation26_spill]] }
 0x31f   : > { %p1756_p4 = scmp.ge.s32.totalorder %s2325_s25, 2 }
 0x324   : > { %s1442_s4 = sand.u32 1, %s2962_s9   ;;  %p2964_p11 = scmp.ne.s32.totalorder %s2963_s8, 0 }
 0x325   : > { %s1443_s15 = scalar_lea.sflag [#allocation6], %s1442_s4 }
 0x326   : > { %p1750_p8 = pnand %p1756_p4, %p2964_p11 }
 0x328   : > { %2268 = dma.done.wait (!%p1750_p8), %s1443_s15, 256  }
 0x329   : > { %2270 = vsyncadd (!%p1750_p8), %s1443_s15, 4294967040  ;;  %s20_s25 = sadd.s32 1, %s2325_s25   ;;  %s2966_s29 = sld [smem:[#allocation16_spill]] }
 0x32a   : > { %p2861_p5 = scmp.ge.s32.totalorder %s20_s25, 10   ;;  %s2967_s14 = sld [smem:[#allocation25_spill]] }
 0x32b   : > { %s2968_s7 = sld [smem:[#allocation17_spill]]  ;;  %s2969_s17 = sld [smem:[#allocation23_spill]] }
 0x32c   : > { %s2970_s20 = sld [smem:[#allocation18_spill]]  ;;  %s2971_s11 = sld [smem:[#allocation24_spill]] }
 0x32d   : > { %s2972_s21 = sld [smem:[#allocation19_spill]]  ;;  %s2973_s22 = sld [smem:[#allocation20_spill]] }
 0x32e   : > { %s2974_s23 = sld [smem:[#allocation21_spill]]  ;;  %s2975_s28 = sld [smem:[#allocation22_spill]] }
 0x32f   : > { %s2977_s12 = smov %s2277_s13  ;;  %s2978_s13 = smov %s2966_s29 }
 0x330   : > { %s2979_s15 = smov %s2289_s16  ;;  %s2981_s18 = smov %s2301_s19 }
 0x331   : > { %s2980_s16 = smov %s2968_s7  ;;  %19 = sbr.rel (!%p2861_p5) target bundleno = 14 (0xe), region = 103 }
 0x332   : > { %s2982_s19 = smov %s2970_s20  ;;  %s2983_s20 = smov %s2971_s11 }
 0x334   : > { %s2984_s24 = smov %s2975_s28 }
 0x338   :  { %1448 = vsyncpa [#allocation5], 1 }
 0x339   :  { %1450 = vsyncpa [#allocation5 + $0x1], 1 }
 0x33a   :  { %1451 = vsyncpa [#allocation8], 1 }
 0x33b   :  { %1452 = vsyncpa [#allocation6], 1 }
 0x33c   :  { %1454 = vsyncpa [#allocation6 + $0x1], 1 }

</bundles_post_ra>
